<compile_context>
chip_gen: v5e
topology: v5e:2x2
jax: 0.10.0
libtpu: 0.0.40
codegen_flags: <defaults>
</compile_context>

<pallas_src>
import functools

import jax
import jax.numpy as jnp
from jax.experimental import pallas as pl
from jax.experimental.pallas import tpu as pltpu

NEG_INF = -1e9


def _round_up(x, m):
    return -(-x // m) * m


def _vmem_capacity_bytes():
    try:
        return int(pltpu.get_tpu_info().vmem_capacity_bytes)
    except Exception:
        return 64 * 1024 * 1024          # conservative fallback


if _vmem_capacity_bytes() <= 64 * 1024 * 1024:     # v7x-class (64 MiB / TensorCore)
    _VMEM_LIMIT = 40 * 1024 * 1024
    _TARGET_ROWS = 256
else:                                              # v5e / v6e (128 MiB)
    _VMEM_LIMIT = 48 * 1024 * 1024
    _TARGET_ROWS = 512


# ----------------------------------------------------------------------------
# small in-kernel helpers
# ----------------------------------------------------------------------------
def _softmax(x, axis=-1):
    m = jnp.max(x, axis=axis, keepdims=True)
    e = jnp.exp(x - m)
    s = jnp.sum(e, axis=axis, keepdims=True)
    return e * pl.reciprocal(s, approx=True)      # divide on the EUP, not the VALU


def _layernorm(x, g, b, eps=1e-5):
    mu = jnp.mean(x, axis=-1, keepdims=True)
    xc = x - mu
    var = jnp.mean(xc * xc, axis=-1, keepdims=True)
    return xc * jax.lax.rsqrt(var + eps) * g + b


# ----------------------------------------------------------------------------
# kernel 1: fused transformer encoder layer (B_blk sequences per grid step,
#           optional fused input projection for the first layer of each encoder)
# ----------------------------------------------------------------------------
def _encoder_kernel(heads, fuse_proj, *refs):
    if fuse_proj:
        (x_ref, kb_ref, pw_ref, pb_ref,
         wq_ref, bq_ref, wk_ref, bk_ref, wv_ref, bv_ref,
         wo_ref, bo_ref, g1_ref, be1_ref,
         w1_ref, b1_ref, w2_ref, b2_ref, g2_ref, be2_ref,
         o_ref) = refs
    else:
        (x_ref, kb_ref,
         wq_ref, bq_ref, wk_ref, bk_ref, wv_ref, bv_ref,
         wo_ref, bo_ref, g1_ref, be1_ref,
         w1_ref, b1_ref, w2_ref, b2_ref, g2_ref, be2_ref,
         o_ref) = refs

    B, T, din = x_ref.shape
    xin = x_ref[...]                                   # bf16 [B, T, din]
    kb = kb_ref[...].reshape(B, 1, 1, T)               # f32 additive key bias

    if fuse_proj:                                      # fused input projection
        x2 = jnp.dot(xin.reshape(B * T, din), pw_ref[...],
                     preferred_element_type=jnp.float32) + pb_ref[...]
    else:
        x2 = xin.reshape(B * T, din).astype(jnp.float32)
    d = x2.shape[-1]
    H = heads
    dh = d // H
    scale = 1.0 / (dh ** 0.5)

    x2_bf = x2.astype(jnp.bfloat16)                    # single cast shared by Q/K/V

    q = jnp.dot(x2_bf, wq_ref[...], preferred_element_type=jnp.float32) + bq_ref[...]
    k = jnp.dot(x2_bf, wk_ref[...], preferred_element_type=jnp.float32) + bk_ref[...]
    v = jnp.dot(x2_bf, wv_ref[...], preferred_element_type=jnp.float32) + bv_ref[...]

    def heads_major(a):                                # [B*T, d] -> [B*H, T, dh] bf16
        a4 = a.astype(jnp.bfloat16).reshape(B, T, H, dh)
        return jnp.swapaxes(a4, 1, 2).reshape(B * H, T, dh)

    qz, kz, vz = heads_major(q), heads_major(k), heads_major(v)

    # batched-heads attention: one relayout per tensor, no per-head slicing/stores
    s = jnp.einsum('zqd,zkd->zqk', qz, kz,
                   preferred_element_type=jnp.float32).reshape(B, H, T, T)
    s = s * scale + kb
    p = _softmax(s, axis=-1).reshape(B * H, T, T).astype(jnp.bfloat16)
    ctx = jnp.einsum('zqk,zkd->zqd', p, vz,
                     preferred_element_type=jnp.float32).astype(jnp.bfloat16)
    ctx2 = jnp.swapaxes(ctx.reshape(B, H, T, dh), 1, 2).reshape(B * T, d)

    attn = jnp.dot(ctx2, wo_ref[...], preferred_element_type=jnp.float32) + bo_ref[...]
    h1 = _layernorm(x2 + attn, g1_ref[...], be1_ref[...])

    ff = jnp.maximum(jnp.dot(h1.astype(jnp.bfloat16), w1_ref[...],
                             preferred_element_type=jnp.float32) + b1_ref[...], 0.0)
    ff = jnp.dot(ff.astype(jnp.bfloat16), w2_ref[...],
                 preferred_element_type=jnp.float32) + b2_ref[...]
    out = _layernorm(h1 + ff, g2_ref[...], be2_ref[...])
    o_ref[...] = out.reshape(B, T, d).astype(o_ref.dtype)


def _run_encoder_layer(x, key_bias, p, heads, proj=None):
    """x: [N, T, din] bf16, key_bias: [N, 1, T] f32 additive bias -> [N, T, d_model] bf16."""
    n, t, din = x.shape
    d = p["wq"].shape[1]

    b_blk = max(1, min(n, _TARGET_ROWS // max(t, 1)))
    if n >= 2:
        b_blk = min(b_blk, max(1, n // 2))             # grid >= 2 (v7x megacore)
    n_pad = _round_up(n, b_blk)
    if n_pad != n:
        x = jnp.pad(x, ((0, n_pad - n), (0, 0), (0, 0)))
        key_bias = jnp.pad(key_bias, ((0, n_pad - n), (0, 0), (0, 0)))

    def full(a):
        # TODO(synk): pipeline_mode=pl.Buffered(1) here would stop double-buffering the
        #             constant-index weight blocks (v7x VMEM headroom only).
        return pl.BlockSpec(a.shape, lambda i: (0,) * a.ndim)

    weights = (p["wq"], p["bq"], p["wk"], p["bk"], p["wv"], p["bv"],
               p["wo"], p["bo"], p["g1"], p["be1"],
               p["w1"], p["b1"], p["w2"], p["b2"], p["g2"], p["be2"])

    inputs = [x, key_bias]
    in_specs = [pl.BlockSpec((b_blk, t, din), lambda i: (i, 0, 0)),
                pl.BlockSpec((b_blk, 1, t), lambda i: (i, 0, 0))]
    if proj is not None:
        inputs += list(proj)
        in_specs += [full(proj[0]), full(proj[1])]
    inputs += list(weights)
    in_specs += [full(w) for w in weights]

    out = pl.pallas_call(
        functools.partial(_encoder_kernel, heads, proj is not None),
        out_shape=jax.ShapeDtypeStruct((n_pad, t, d), jnp.bfloat16),
        grid=(n_pad // b_blk,),
        in_specs=in_specs,
        out_specs=pl.BlockSpec((b_blk, t, d), lambda i: (i, 0, 0)),
        compiler_params=pltpu.CompilerParams(
            dimension_semantics=("parallel",),
            vmem_limit_bytes=_VMEM_LIMIT),
    )(*inputs)
    return out[:n] if n_pad != n else out


def transformer_encoder(params, x, key_bias, heads):
    layers = params["layers"]
    assert len(layers) >= 1, "TransformerEncoder needs at least one layer"
    h = _run_encoder_layer(x.astype(jnp.bfloat16), key_bias, layers[0], heads,
                           proj=(params["proj_w"], params["proj_b"]))
    for layer in layers[1:]:
        h = _run_encoder_layer(h, key_bias, layer, heads)
    return h


# ----------------------------------------------------------------------------
# kernel 2: dual attention, grid = (batch, K).  Passage side per chunk, question
#           side accumulated across chunks with an online softmax.
# ----------------------------------------------------------------------------
def _dual_attention_kernel(ep_ref, eq_ref, pb_ref, qb_ref,
                           wp_ref, wq_ref, wpq_ref,
                           gp_ref, gq_ref,
                           m_acc, l_acc, aq_acc, bq_acc):
    k_idx = pl.program_id(1)
    n_k = pl.num_programs(1)

    ep = ep_ref[0, 0]                              # [L, d] bf16 (this passage chunk)
    eq = eq_ref[0]                                 # [Jp, d] bf16 (J padded to lanes)
    pb = pb_ref[0, 0]                              # [L, 1] f32 additive passage bias
    qb = qb_ref[0]                                 # [1, Jp] f32 additive question bias
    wp = wp_ref[...].astype(jnp.bfloat16)          # [1, d]
    wqv = wq_ref[...].astype(jnp.bfloat16)         # [1, d]
    wpq = wpq_ref[...].astype(jnp.bfloat16)        # [1, d]

    L, d = ep.shape

    @pl.when(k_idx == 0)                           # reset question-side accumulators
    def _():
        m_acc[...] = jnp.full(m_acc.shape, NEG_INF, m_acc.dtype)
        l_acc[...] = jnp.zeros(l_acc.shape, l_acc.dtype)
        aq_acc[...] = jnp.zeros(aq_acc.shape, aq_acc.dtype)
        bq_acc[...] = jnp.zeros(bq_acc.shape, bq_acc.dtype)

    # trilinear similarity S[l, j]; wpq folded into the (small) question side
    p_col = jnp.einsum('ld,xd->lx', ep, wp, preferred_element_type=jnp.float32)    # [L, 1]
    q_row = jnp.einsum('xd,jd->xj', wqv, eq, preferred_element_type=jnp.float32)   # [1, Jp]
    S = jnp.einsum('ld,jd->lj', ep, eq * wpq,
                   preferred_element_type=jnp.float32) + p_col + q_row             # [L, Jp]

    # passage -> question attention (per chunk)
    A = _softmax(S + qb, axis=-1)                                                  # [L, Jp]
    A_bf = A.astype(jnp.bfloat16)
    abar = jnp.dot(A_bf, eq, preferred_element_type=jnp.float32)                   # [L, d]

    # question -> this-chunk passage weights: softmax over L (axis 0, no transpose)
    Sp = S + pb                                                                    # [L, Jp]
    Bw = jnp.exp(Sp - jnp.max(Sp, axis=0, keepdims=True))
    Bw = Bw * pl.reciprocal(jnp.sum(Bw, axis=0, keepdims=True), approx=True)
    tmp = jnp.einsum('lj,ld->jd', Bw.astype(jnp.bfloat16), ep,
                     preferred_element_type=jnp.float32)                           # [Jp, d]
    bbar = jnp.dot(A_bf, tmp.astype(jnp.bfloat16),
                   preferred_element_type=jnp.float32)                             # [L, d]

    # Gp chunk = [Ep ; Abar ; Ep*Abar ; Bbar ; Ep*Bbar] (lane-offset stores, bf16)
    ep_f = ep.astype(jnp.float32)
    gp_ref[0, 0, :, 0 * d:1 * d] = ep
    gp_ref[0, 0, :, 1 * d:2 * d] = abar.astype(jnp.bfloat16)
    gp_ref[0, 0, :, 2 * d:3 * d] = (ep_f * abar).astype(jnp.bfloat16)
    gp_ref[0, 0, :, 3 * d:4 * d] = bbar.astype(jnp.bfloat16)
    gp_ref[0, 0, :, 4 * d:5 * d] = (ep_f * bbar).astype(jnp.bfloat16)

    # question -> all K*L passage tokens: online softmax accumulated across chunks
    m_prev = m_acc[...]                                                            # [1, Jp]
    m_new = jnp.maximum(m_prev, jnp.max(Sp, axis=0, keepdims=True))
    alpha = jnp.exp(m_prev - m_new)
    pexp = jnp.exp(Sp - m_new)                                                     # [L, Jp]
    pexp_bf = pexp.astype(jnp.bfloat16)
    l_acc[...] = alpha * l_acc[...] + jnp.sum(pexp, axis=0, keepdims=True)
    aq_acc[...] = alpha * aq_acc[...] + jnp.einsum(
        'ld,lj->dj', ep, pexp_bf, preferred_element_type=jnp.float32)
    bq_acc[...] = alpha * bq_acc[...] + jnp.einsum(
        'ld,lj->dj', abar.astype(jnp.bfloat16), pexp_bf,
        preferred_element_type=jnp.float32)
    m_acc[...] = m_new

    @pl.when(k_idx == n_k - 1)                     # finalize Gq once per batch element
    def _():
        inv_l = pl.reciprocal(l_acc[...], approx=True)                             # [1, Jp]
        aqbar = (aq_acc[...] * inv_l).T                                            # [Jp, d]
        bqbar = (bq_acc[...] * inv_l).T
        eq_f = eq.astype(jnp.float32)
        gq_ref[0, :, 0 * d:1 * d] = eq
        gq_ref[0, :, 1 * d:2 * d] = aqbar.astype(jnp.bfloat16)
        gq_ref[0, :, 2 * d:3 * d] = (eq_f * aqbar).astype(jnp.bfloat16)
        gq_ref[0, :, 3 * d:4 * d] = bqbar.astype(jnp.bfloat16)
        gq_ref[0, :, 4 * d:5 * d] = (eq_f * bqbar).astype(jnp.bfloat16)


def dual_attention(ep, eq, pb_col, qb, dparams):
    """ep: [bs,K,L,d] bf16, eq: [bs,Jp,d] bf16, pb_col: [bs,K,L,1] f32, qb: [bs,1,Jp] f32."""
    bs, K, L, d = ep.shape
    Jp = eq.shape[1]
    return pl.pallas_call(
        _dual_attention_kernel,
        out_shape=(jax.ShapeDtypeStruct((bs, K, L, 5 * d), jnp.bfloat16),
                   jax.ShapeDtypeStruct((bs, Jp, 5 * d), jnp.bfloat16)),
        grid=(bs, K),
        in_specs=[pl.BlockSpec((1, 1, L, d), lambda b, k: (b, k, 0, 0)),
                  pl.BlockSpec((1, Jp, d), lambda b, k: (b, 0, 0)),
                  pl.BlockSpec((1, 1, L, 1), lambda b, k: (b, k, 0, 0)),
                  pl.BlockSpec((1, 1, Jp), lambda b, k: (b, 0, 0)),
                  pl.BlockSpec((1, d), lambda b, k: (0, 0)),
                  pl.BlockSpec((1, d), lambda b, k: (0, 0)),
                  pl.BlockSpec((1, d), lambda b, k: (0, 0))],
        out_specs=(pl.BlockSpec((1, 1, L, 5 * d), lambda b, k: (b, k, 0, 0)),
                   pl.BlockSpec((1, Jp, 5 * d), lambda b, k: (b, 0, 0))),
        scratch_shapes=[pltpu.VMEM((1, Jp), jnp.float32),     # running max
                        pltpu.VMEM((1, Jp), jnp.float32),     # running denom
                        pltpu.VMEM((d, Jp), jnp.float32),     # Aq @ Ep accumulator
                        pltpu.VMEM((d, Jp), jnp.float32)],    # Aq @ Abar accumulator
        compiler_params=pltpu.CompilerParams(
            dimension_semantics=("parallel", "arbitrary"),
            vmem_limit_bytes=_VMEM_LIMIT),
    )(ep, eq, pb_col, qb, dparams["wp"], dparams["wq"], dparams["wpq"])


# ----------------------------------------------------------------------------
# parameter init (deterministic, synthetic) -- matmul weights stored in bf16
# ----------------------------------------------------------------------------
def _init_linear(key, din, dout):
    kw, kb = jax.random.split(key)
    w = (jax.random.normal(kw, (din, dout), jnp.float32) * (1.0 / (din ** 0.5))
         ).astype(jnp.bfloat16)
    b = jax.random.normal(kb, (1, dout), jnp.float32) * 0.01
    return w, b


def _init_encoder(key, num_layers, d_in, d_inner, d_model):
    keys = jax.random.split(key, 1 + num_layers)
    pw, pb = _init_linear(keys[0], d_in, d_model)
    layers = []
    for i in range(num_layers):
        ks = jax.random.split(keys[1 + i], 6)
        wq, bq = _init_linear(ks[0], d_model, d_model)
        wk, bk = _init_linear(ks[1], d_model, d_model)
        wv, bv = _init_linear(ks[2], d_model, d_model)
        wo, bo = _init_linear(ks[3], d_model, d_model)
        w1, b1 = _init_linear(ks[4], d_model, d_inner)
        w2, b2 = _init_linear(ks[5], d_inner, d_model)
        layers.append(dict(
            wq=wq, bq=bq, wk=wk, bk=bk, wv=wv, bv=bv, wo=wo, bo=bo,
            g1=jnp.ones((1, d_model), jnp.float32), be1=jnp.zeros((1, d_model), jnp.float32),
            w1=w1, b1=b1, w2=w2, b2=b2,
            g2=jnp.ones((1, d_model), jnp.float32), be2=jnp.zeros((1, d_model), jnp.float32)))
    return dict(proj_w=pw, proj_b=pb, layers=layers)


def init_qa_reader(key, d_emb, d_model, d_inner, heads,
                   n_shared, n_passage, n_question, include_dec):
    ks = jax.random.split(key, 4)
    params = dict(
        d_model=d_model, heads=heads,
        shared=_init_encoder(ks[0], n_shared, d_emb, d_inner, d_model),
        passage=_init_encoder(ks[1], n_passage, 5 * d_model, d_inner, d_model),
        dual=dict(
            wp=jax.random.normal(jax.random.fold_in(ks[2], 0), (1, d_model), jnp.float32) * 0.1,
            wq=jax.random.normal(jax.random.fold_in(ks[2], 1), (1, d_model), jnp.float32) * 0.1,
            wpq=jax.random.normal(jax.random.fold_in(ks[2], 2), (1, d_model), jnp.float32) * 0.1),
    )
    if include_dec:
        params["question"] = _init_encoder(ks[3], n_question, 5 * d_model, d_inner, d_model)
    return params


# ----------------------------------------------------------------------------
# QaReader forward (glue in plain JAX, hot paths in Pallas)
# ----------------------------------------------------------------------------
def _key_bias(mask):
    """[N, T, 1] validity mask -> additive, lane-major [N, 1, T] key bias (f32)."""
    return ((1.0 - mask[..., 0]) * NEG_INF)[:, None, :]


def qa_reader_forward(params, p_emb, q_emb, mask_p, mask_q, pad_idx):
    bs, K, L, _ = mask_p.shape
    J = mask_q.shape[1]
    d_model = params["d_model"]
    heads = params["heads"]

    mask_p_f = mask_p.astype(jnp.float32)                 # [bs, K, L, 1]
    mask_q_f = mask_q.astype(jnp.float32)                 # [bs, J, 1]
    mask_p2 = mask_p_f.reshape(bs * K, L, 1)

    p_emb = p_emb.astype(jnp.bfloat16)
    q_emb = q_emb.astype(jnp.bfloat16)

    # _forward_concat: pad question to passage length, concat along the batch dim
    if L > J:
        q_emb_p = jnp.pad(q_emb, ((0, 0), (0, L - J), (0, 0)),
                          constant_values=float(pad_idx))
        mask_q_pad = jnp.pad(mask_q_f, ((0, 0), (0, L - J), (0, 0)))
    else:
        q_emb_p, mask_q_pad = q_emb, mask_q_f

    pq_emb = jnp.concatenate([p_emb, q_emb_p], axis=0)     # [bs*K + bs, L, d_emb]
    mask_pq = jnp.concatenate([mask_p2, mask_q_pad], axis=0)

    epq = transformer_encoder(params["shared"], pq_emb, _key_bias(mask_pq), heads)  # bf16
    ep = epq[:bs * K].reshape(bs, K, L, d_model)
    eq = epq[bs * K:][:, :J]                               # narrow back to J

    # dual attention: J padded to a lane multiple, masked with NEG_INF biases
    Jp = _round_up(J, 128)
    eq_p = jnp.pad(eq, ((0, 0), (0, Jp - J), (0, 0)))              # bf16 zero pad
    q_valid = jnp.pad(mask_q_f[..., 0], ((0, 0), (0, Jp - J)))     # [bs, Jp]
    qb = ((1.0 - q_valid) * NEG_INF)[:, None, :]                   # [bs, 1, Jp]
    pb_col = (1.0 - mask_p_f) * NEG_INF                            # [bs, K, L, 1]

    gp, gq = dual_attention(ep, eq_p, pb_col, qb, params["dual"])  # bf16 outputs

    gp = gp.reshape(bs * K, L, 5 * d_model)
    mp = transformer_encoder(params["passage"], gp, _key_bias(mask_p2), heads)
    mp = mp.reshape(bs, K, L, d_model).astype(jnp.float32)

    if "question" in params:
        gq_n = gq[:, :J]                                           # narrow back to J
        mq = transformer_encoder(params["question"], gq_n, _key_bias(mask_q_f), heads)
        mq = mq.astype(jnp.float32)
    else:
        mq = None
    return mp, mq


# ----------------------------------------------------------------------------
if __name__ == "__main__":
    # small, module-consistent shapes
    bs, K, L, J = 2, 2, 8, 6
    d_emb, d_model, d_inner, heads = 16, 32, 64, 2
    pad_idx = 0

    key = jax.random.PRNGKey(0)
    k_param, k_p, k_q = jax.random.split(key, 3)

    params = init_qa_reader(k_param, d_emb, d_model, d_inner, heads,
                            n_shared=1, n_passage=1, n_question=1, include_dec=True)

    p_emb = jax.random.normal(k_p, (bs * K, L, d_emb), jnp.float32)
    q_emb = jax.random.normal(k_q, (bs, J, d_emb), jnp.float32)
    mask_p = jnp.ones((bs, K, L, 1), dtype=jnp.bool_)
    mask_q = jnp.ones((bs, J, 1), dtype=jnp.bool_)

    Mp, Mq = qa_reader_forward(params, p_emb, q_emb, mask_p, mask_q, pad_idx)
    Mp = jax.block_until_ready(Mp)
    Mq = jax.block_until_ready(Mq)

    assert Mp.shape == (bs, K, L, d_model)
    assert Mq.shape == (bs, J, d_model)
    assert bool(jnp.all(jnp.isfinite(Mp))) and bool(jnp.all(jnp.isfinite(Mq)))
    print("KERNEL_OK")
</pallas_src>

<mosaic_0001>
module attributes {stable_mosaic.version = 11 : i64} {
  func.func @_encoder_kernel(%arg0: i32, %arg1: memref<3x8x16xbf16, #tpu.memory_space<vmem>>, %arg2: memref<3x1x8xf32, #tpu.memory_space<vmem>>, %arg3: memref<16x32xbf16, #tpu.memory_space<vmem>>, %arg4: memref<1x32xf32, #tpu.memory_space<vmem>>, %arg5: memref<32x32xbf16, #tpu.memory_space<vmem>>, %arg6: memref<1x32xf32, #tpu.memory_space<vmem>>, %arg7: memref<32x32xbf16, #tpu.memory_space<vmem>>, %arg8: memref<1x32xf32, #tpu.memory_space<vmem>>, %arg9: memref<32x32xbf16, #tpu.memory_space<vmem>>, %arg10: memref<1x32xf32, #tpu.memory_space<vmem>>, %arg11: memref<32x32xbf16, #tpu.memory_space<vmem>>, %arg12: memref<1x32xf32, #tpu.memory_space<vmem>>, %arg13: memref<1x32xf32, #tpu.memory_space<vmem>>, %arg14: memref<1x32xf32, #tpu.memory_space<vmem>>, %arg15: memref<32x64xbf16, #tpu.memory_space<vmem>>, %arg16: memref<1x64xf32, #tpu.memory_space<vmem>>, %arg17: memref<64x32xbf16, #tpu.memory_space<vmem>>, %arg18: memref<1x32xf32, #tpu.memory_space<vmem>>, %arg19: memref<1x32xf32, #tpu.memory_space<vmem>>, %arg20: memref<1x32xf32, #tpu.memory_space<vmem>>, %arg21: memref<3x8x32xbf16, #tpu.memory_space<vmem>>) attributes {dimension_semantics = [#tpu.dimension_semantics<parallel>], iteration_bounds = array<i64: 2>, scalar_prefetch = 0 : i64, scratch_operands = 0 : i64, tpu.core_type = #tpu.core_type<tc>, window_params = [{transform_indices = @transform_0, window_bounds = array<i64: 3, 8, 16>}, {transform_indices = @transform_1, window_bounds = array<i64: 3, 1, 8>}, {pipeline_mode = #tpu.pipeline_mode<synchronous>, transform_indices = @transform_2, window_bounds = array<i64: 16, 32>}, {pipeline_mode = #tpu.pipeline_mode<synchronous>, transform_indices = @transform_3, window_bounds = array<i64: 1, 32>}, {pipeline_mode = #tpu.pipeline_mode<synchronous>, transform_indices = @transform_4, window_bounds = array<i64: 32, 32>}, {pipeline_mode = #tpu.pipeline_mode<synchronous>, transform_indices = @transform_5, window_bounds = array<i64: 1, 32>}, {pipeline_mode = #tpu.pipeline_mode<synchronous>, transform_indices = @transform_6, window_bounds = array<i64: 32, 32>}, {pipeline_mode = #tpu.pipeline_mode<synchronous>, transform_indices = @transform_7, window_bounds = array<i64: 1, 32>}, {pipeline_mode = #tpu.pipeline_mode<synchronous>, transform_indices = @transform_8, window_bounds = array<i64: 32, 32>}, {pipeline_mode = #tpu.pipeline_mode<synchronous>, transform_indices = @transform_9, window_bounds = array<i64: 1, 32>}, {pipeline_mode = #tpu.pipeline_mode<synchronous>, transform_indices = @transform_10, window_bounds = array<i64: 32, 32>}, {pipeline_mode = #tpu.pipeline_mode<synchronous>, transform_indices = @transform_11, window_bounds = array<i64: 1, 32>}, {pipeline_mode = #tpu.pipeline_mode<synchronous>, transform_indices = @transform_12, window_bounds = array<i64: 1, 32>}, {pipeline_mode = #tpu.pipeline_mode<synchronous>, transform_indices = @transform_13, window_bounds = array<i64: 1, 32>}, {pipeline_mode = #tpu.pipeline_mode<synchronous>, transform_indices = @transform_14, window_bounds = array<i64: 32, 64>}, {pipeline_mode = #tpu.pipeline_mode<synchronous>, transform_indices = @transform_15, window_bounds = array<i64: 1, 64>}, {pipeline_mode = #tpu.pipeline_mode<synchronous>, transform_indices = @transform_16, window_bounds = array<i64: 64, 32>}, {pipeline_mode = #tpu.pipeline_mode<synchronous>, transform_indices = @transform_17, window_bounds = array<i64: 1, 32>}, {pipeline_mode = #tpu.pipeline_mode<synchronous>, transform_indices = @transform_18, window_bounds = array<i64: 1, 32>}, {pipeline_mode = #tpu.pipeline_mode<synchronous>, transform_indices = @transform_19, window_bounds = array<i64: 1, 32>}, {transform_indices = @transform_20, window_bounds = array<i64: 3, 8, 32>}]} {
    %c0 = arith.constant 0 : index
    %c0_0 = arith.constant 0 : index
    %c0_1 = arith.constant 0 : index
    %0 = vector.load %arg1[%c0, %c0_0, %c0_1] : memref<3x8x16xbf16, #tpu.memory_space<vmem>>, vector<3x8x16xbf16>
    %c0_2 = arith.constant 0 : index
    %c0_3 = arith.constant 0 : index
    %c0_4 = arith.constant 0 : index
    %1 = vector.load %arg2[%c0_2, %c0_3, %c0_4] : memref<3x1x8xf32, #tpu.memory_space<vmem>>, vector<3x1x8xf32>
    %2 = vector.shape_cast %1 : vector<3x1x8xf32> to vector<3x1x1x8xf32>
    %3 = vector.shape_cast %0 : vector<3x8x16xbf16> to vector<24x16xbf16>
    %c0_5 = arith.constant 0 : index
    %c0_6 = arith.constant 0 : index
    %4 = vector.load %arg3[%c0_5, %c0_6] : memref<16x32xbf16, #tpu.memory_space<vmem>>, vector<16x32xbf16>
    %cst = arith.constant dense<0.000000e+00> : vector<24x32xf32>
    %5 = tpu.matmul %3, %4, %cst {dimension_numbers = #tpu.dot_dimension_numbers<[1], [0], [0], [1], [0, 0, 1, 1], [], []>} : vector<24x16xbf16>, vector<16x32xbf16>, vector<24x32xf32> -> vector<24x32xf32>
    %c0_7 = arith.constant 0 : index
    %c0_8 = arith.constant 0 : index
    %6 = vector.load %arg4[%c0_7, %c0_8] : memref<1x32xf32, #tpu.memory_space<vmem>>, vector<1x32xf32>
    %7 = vector.broadcast %6 : vector<1x32xf32> to vector<24x32xf32>
    %8 = arith.addf %5, %7 : vector<24x32xf32>
    %9 = arith.truncf %8 : vector<24x32xf32> to vector<24x32xbf16>
    %c0_9 = arith.constant 0 : index
    %c0_10 = arith.constant 0 : index
    %10 = vector.load %arg5[%c0_9, %c0_10] : memref<32x32xbf16, #tpu.memory_space<vmem>>, vector<32x32xbf16>
    %cst_11 = arith.constant dense<0.000000e+00> : vector<24x32xf32>
    %11 = tpu.matmul %9, %10, %cst_11 {dimension_numbers = #tpu.dot_dimension_numbers<[1], [0], [0], [1], [0, 0, 1, 1], [], []>} : vector<24x32xbf16>, vector<32x32xbf16>, vector<24x32xf32> -> vector<24x32xf32>
    %c0_12 = arith.constant 0 : index
    %c0_13 = arith.constant 0 : index
    %12 = vector.load %arg6[%c0_12, %c0_13] : memref<1x32xf32, #tpu.memory_space<vmem>>, vector<1x32xf32>
    %13 = vector.broadcast %12 : vector<1x32xf32> to vector<24x32xf32>
    %14 = arith.addf %11, %13 : vector<24x32xf32>
    %c0_14 = arith.constant 0 : index
    %c0_15 = arith.constant 0 : index
    %15 = vector.load %arg7[%c0_14, %c0_15] : memref<32x32xbf16, #tpu.memory_space<vmem>>, vector<32x32xbf16>
    %cst_16 = arith.constant dense<0.000000e+00> : vector<24x32xf32>
    %16 = tpu.matmul %9, %15, %cst_16 {dimension_numbers = #tpu.dot_dimension_numbers<[1], [0], [0], [1], [0, 0, 1, 1], [], []>} : vector<24x32xbf16>, vector<32x32xbf16>, vector<24x32xf32> -> vector<24x32xf32>
    %c0_17 = arith.constant 0 : index
    %c0_18 = arith.constant 0 : index
    %17 = vector.load %arg8[%c0_17, %c0_18] : memref<1x32xf32, #tpu.memory_space<vmem>>, vector<1x32xf32>
    %18 = vector.broadcast %17 : vector<1x32xf32> to vector<24x32xf32>
    %19 = arith.addf %16, %18 : vector<24x32xf32>
    %c0_19 = arith.constant 0 : index
    %c0_20 = arith.constant 0 : index
    %20 = vector.load %arg9[%c0_19, %c0_20] : memref<32x32xbf16, #tpu.memory_space<vmem>>, vector<32x32xbf16>
    %cst_21 = arith.constant dense<0.000000e+00> : vector<24x32xf32>
    %21 = tpu.matmul %9, %20, %cst_21 {dimension_numbers = #tpu.dot_dimension_numbers<[1], [0], [0], [1], [0, 0, 1, 1], [], []>} : vector<24x32xbf16>, vector<32x32xbf16>, vector<24x32xf32> -> vector<24x32xf32>
    %c0_22 = arith.constant 0 : index
    %c0_23 = arith.constant 0 : index
    %22 = vector.load %arg10[%c0_22, %c0_23] : memref<1x32xf32, #tpu.memory_space<vmem>>, vector<1x32xf32>
    %23 = vector.broadcast %22 : vector<1x32xf32> to vector<24x32xf32>
    %24 = arith.addf %21, %23 : vector<24x32xf32>
    %25 = arith.truncf %14 : vector<24x32xf32> to vector<24x32xbf16>
    %26 = vector.shape_cast %25 : vector<24x32xbf16> to vector<3x8x2x16xbf16>
    %27 = tpu.transpose %26, [0, 2, 1, 3] : vector<3x8x2x16xbf16> -> vector<3x2x8x16xbf16>
    %28 = vector.shape_cast %27 : vector<3x2x8x16xbf16> to vector<6x8x16xbf16>
    %29 = arith.truncf %19 : vector<24x32xf32> to vector<24x32xbf16>
    %30 = vector.shape_cast %29 : vector<24x32xbf16> to vector<3x8x2x16xbf16>
    %31 = tpu.transpose %30, [0, 2, 1, 3] : vector<3x8x2x16xbf16> -> vector<3x2x8x16xbf16>
    %32 = vector.shape_cast %31 : vector<3x2x8x16xbf16> to vector<6x8x16xbf16>
    %33 = arith.truncf %24 : vector<24x32xf32> to vector<24x32xbf16>
    %34 = vector.shape_cast %33 : vector<24x32xbf16> to vector<3x8x2x16xbf16>
    %35 = tpu.transpose %34, [0, 2, 1, 3] : vector<3x8x2x16xbf16> -> vector<3x2x8x16xbf16>
    %36 = vector.shape_cast %35 : vector<3x2x8x16xbf16> to vector<6x8x16xbf16>
    "tpu.trace_start"() <{level = 10 : i32, message = "zqd,zkd->zqk"}> : () -> ()
    %cst_24 = arith.constant dense<0.000000e+00> : vector<6x8x8xf32>
    %37 = tpu.matmul %28, %32, %cst_24 {dimension_numbers = #tpu.dot_dimension_numbers<[2], [2], [1], [1], [0, 0, 0, 1, 1, 1], [0], [0]>} : vector<6x8x16xbf16>, vector<6x8x16xbf16>, vector<6x8x8xf32> -> vector<6x8x8xf32>
    "tpu.trace_stop"() : () -> ()
    %38 = vector.shape_cast %37 : vector<6x8x8xf32> to vector<3x2x8x8xf32>
    %cst_25 = arith.constant 2.500000e-01 : f32
    %39 = vector.broadcast %cst_25 : f32 to vector<3x2x8x8xf32>
    %40 = arith.mulf %38, %39 : vector<3x2x8x8xf32>
    %41 = vector.broadcast %2 : vector<3x1x1x8xf32> to vector<3x2x8x8xf32>
    %42 = arith.addf %40, %41 : vector<3x2x8x8xf32>
    %cst_26 = arith.constant dense<0xFF800000> : vector<3x2x8xf32>
    %43 = vector.multi_reduction <maximumf>, %42, %cst_26 [3] : vector<3x2x8x8xf32> to vector<3x2x8xf32>
    %44 = vector.shape_cast %43 : vector<3x2x8xf32> to vector<3x2x8x1xf32>
    %45 = vector.broadcast %44 : vector<3x2x8x1xf32> to vector<3x2x8x8xf32>
    %46 = arith.subf %42, %45 : vector<3x2x8x8xf32>
    %47 = math.exp %46 : vector<3x2x8x8xf32>
    %cst_27 = arith.constant dense<0.000000e+00> : vector<3x2x8xf32>
    %48 = vector.multi_reduction <add>, %47, %cst_27 [3] : vector<3x2x8x8xf32> to vector<3x2x8xf32>
    %49 = vector.shape_cast %48 : vector<3x2x8xf32> to vector<3x2x8x1xf32>
    %50 = tpu.reciprocal %49 {approx = true} : vector<3x2x8x1xf32> -> vector<3x2x8x1xf32>
    %51 = vector.broadcast %50 : vector<3x2x8x1xf32> to vector<3x2x8x8xf32>
    %52 = arith.mulf %47, %51 : vector<3x2x8x8xf32>
    %53 = vector.shape_cast %52 : vector<3x2x8x8xf32> to vector<6x8x8xf32>
    %54 = arith.truncf %53 : vector<6x8x8xf32> to vector<6x8x8xbf16>
    "tpu.trace_start"() <{level = 10 : i32, message = "zqk,zkd->zqd"}> : () -> ()
    %cst_28 = arith.constant dense<0.000000e+00> : vector<6x8x16xf32>
    %55 = tpu.matmul %54, %36, %cst_28 {dimension_numbers = #tpu.dot_dimension_numbers<[2], [1], [1], [2], [0, 0, 0, 1, 1, 2], [0], [0]>} : vector<6x8x8xbf16>, vector<6x8x16xbf16>, vector<6x8x16xf32> -> vector<6x8x16xf32>
    "tpu.trace_stop"() : () -> ()
    %56 = arith.truncf %55 : vector<6x8x16xf32> to vector<6x8x16xbf16>
    %57 = vector.shape_cast %56 : vector<6x8x16xbf16> to vector<3x2x8x16xbf16>
    %58 = tpu.transpose %57, [0, 2, 1, 3] : vector<3x2x8x16xbf16> -> vector<3x8x2x16xbf16>
    %59 = vector.shape_cast %58 : vector<3x8x2x16xbf16> to vector<24x32xbf16>
    %c0_29 = arith.constant 0 : index
    %c0_30 = arith.constant 0 : index
    %60 = vector.load %arg11[%c0_29, %c0_30] : memref<32x32xbf16, #tpu.memory_space<vmem>>, vector<32x32xbf16>
    %cst_31 = arith.constant dense<0.000000e+00> : vector<24x32xf32>
    %61 = tpu.matmul %59, %60, %cst_31 {dimension_numbers = #tpu.dot_dimension_numbers<[1], [0], [0], [1], [0, 0, 1, 1], [], []>} : vector<24x32xbf16>, vector<32x32xbf16>, vector<24x32xf32> -> vector<24x32xf32>
    %c0_32 = arith.constant 0 : index
    %c0_33 = arith.constant 0 : index
    %62 = vector.load %arg12[%c0_32, %c0_33] : memref<1x32xf32, #tpu.memory_space<vmem>>, vector<1x32xf32>
    %63 = vector.broadcast %62 : vector<1x32xf32> to vector<24x32xf32>
    %64 = arith.addf %61, %63 : vector<24x32xf32>
    %65 = arith.addf %8, %64 : vector<24x32xf32>
    %c0_34 = arith.constant 0 : index
    %c0_35 = arith.constant 0 : index
    %66 = vector.load %arg13[%c0_34, %c0_35] : memref<1x32xf32, #tpu.memory_space<vmem>>, vector<1x32xf32>
    %c0_36 = arith.constant 0 : index
    %c0_37 = arith.constant 0 : index
    %67 = vector.load %arg14[%c0_36, %c0_37] : memref<1x32xf32, #tpu.memory_space<vmem>>, vector<1x32xf32>
    %cst_38 = arith.constant dense<0.000000e+00> : vector<24xf32>
    %68 = vector.multi_reduction <add>, %65, %cst_38 [1] : vector<24x32xf32> to vector<24xf32>
    %69 = vector.shape_cast %68 : vector<24xf32> to vector<24x1xf32>
    %cst_39 = arith.constant 3.200000e+01 : f32
    %70 = vector.broadcast %cst_39 : f32 to vector<24x1xf32>
    %71 = arith.divf %69, %70 : vector<24x1xf32>
    %72 = vector.broadcast %71 : vector<24x1xf32> to vector<24x32xf32>
    %73 = arith.subf %65, %72 : vector<24x32xf32>
    %74 = arith.mulf %73, %73 : vector<24x32xf32>
    %cst_40 = arith.constant dense<0.000000e+00> : vector<24xf32>
    %75 = vector.multi_reduction <add>, %74, %cst_40 [1] : vector<24x32xf32> to vector<24xf32>
    %76 = vector.shape_cast %75 : vector<24xf32> to vector<24x1xf32>
    %cst_41 = arith.constant 3.200000e+01 : f32
    %77 = vector.broadcast %cst_41 : f32 to vector<24x1xf32>
    %78 = arith.divf %76, %77 : vector<24x1xf32>
    %cst_42 = arith.constant 9.99999974E-6 : f32
    %79 = vector.broadcast %cst_42 : f32 to vector<24x1xf32>
    %80 = arith.addf %78, %79 : vector<24x1xf32>
    %81 = math.rsqrt %80 : vector<24x1xf32>
    %82 = vector.broadcast %81 : vector<24x1xf32> to vector<24x32xf32>
    %83 = arith.mulf %73, %82 : vector<24x32xf32>
    %84 = vector.broadcast %66 : vector<1x32xf32> to vector<24x32xf32>
    %85 = arith.mulf %83, %84 : vector<24x32xf32>
    %86 = vector.broadcast %67 : vector<1x32xf32> to vector<24x32xf32>
    %87 = arith.addf %85, %86 : vector<24x32xf32>
    %88 = arith.truncf %87 : vector<24x32xf32> to vector<24x32xbf16>
    %c0_43 = arith.constant 0 : index
    %c0_44 = arith.constant 0 : index
    %89 = vector.load %arg15[%c0_43, %c0_44] : memref<32x64xbf16, #tpu.memory_space<vmem>>, vector<32x64xbf16>
    %cst_45 = arith.constant dense<0.000000e+00> : vector<24x64xf32>
    %90 = tpu.matmul %88, %89, %cst_45 {dimension_numbers = #tpu.dot_dimension_numbers<[1], [0], [0], [1], [0, 0, 1, 1], [], []>} : vector<24x32xbf16>, vector<32x64xbf16>, vector<24x64xf32> -> vector<24x64xf32>
    %c0_46 = arith.constant 0 : index
    %c0_47 = arith.constant 0 : index
    %91 = vector.load %arg16[%c0_46, %c0_47] : memref<1x64xf32, #tpu.memory_space<vmem>>, vector<1x64xf32>
    %92 = vector.broadcast %91 : vector<1x64xf32> to vector<24x64xf32>
    %93 = arith.addf %90, %92 : vector<24x64xf32>
    %cst_48 = arith.constant 0.000000e+00 : f32
    %94 = vector.broadcast %cst_48 : f32 to vector<24x64xf32>
    %95 = arith.maximumf %93, %94 : vector<24x64xf32>
    %96 = arith.truncf %95 : vector<24x64xf32> to vector<24x64xbf16>
    %c0_49 = arith.constant 0 : index
    %c0_50 = arith.constant 0 : index
    %97 = vector.load %arg17[%c0_49, %c0_50] : memref<64x32xbf16, #tpu.memory_space<vmem>>, vector<64x32xbf16>
    %cst_51 = arith.constant dense<0.000000e+00> : vector<24x32xf32>
    %98 = tpu.matmul %96, %97, %cst_51 {dimension_numbers = #tpu.dot_dimension_numbers<[1], [0], [0], [1], [0, 0, 1, 1], [], []>} : vector<24x64xbf16>, vector<64x32xbf16>, vector<24x32xf32> -> vector<24x32xf32>
    %c0_52 = arith.constant 0 : index
    %c0_53 = arith.constant 0 : index
    %99 = vector.load %arg18[%c0_52, %c0_53] : memref<1x32xf32, #tpu.memory_space<vmem>>, vector<1x32xf32>
    %100 = vector.broadcast %99 : vector<1x32xf32> to vector<24x32xf32>
    %101 = arith.addf %98, %100 : vector<24x32xf32>
    %102 = arith.addf %87, %101 : vector<24x32xf32>
    %c0_54 = arith.constant 0 : index
    %c0_55 = arith.constant 0 : index
    %103 = vector.load %arg19[%c0_54, %c0_55] : memref<1x32xf32, #tpu.memory_space<vmem>>, vector<1x32xf32>
    %c0_56 = arith.constant 0 : index
    %c0_57 = arith.constant 0 : index
    %104 = vector.load %arg20[%c0_56, %c0_57] : memref<1x32xf32, #tpu.memory_space<vmem>>, vector<1x32xf32>
    %cst_58 = arith.constant dense<0.000000e+00> : vector<24xf32>
    %105 = vector.multi_reduction <add>, %102, %cst_58 [1] : vector<24x32xf32> to vector<24xf32>
    %106 = vector.shape_cast %105 : vector<24xf32> to vector<24x1xf32>
    %cst_59 = arith.constant 3.200000e+01 : f32
    %107 = vector.broadcast %cst_59 : f32 to vector<24x1xf32>
    %108 = arith.divf %106, %107 : vector<24x1xf32>
    %109 = vector.broadcast %108 : vector<24x1xf32> to vector<24x32xf32>
    %110 = arith.subf %102, %109 : vector<24x32xf32>
    %111 = arith.mulf %110, %110 : vector<24x32xf32>
    %cst_60 = arith.constant dense<0.000000e+00> : vector<24xf32>
    %112 = vector.multi_reduction <add>, %111, %cst_60 [1] : vector<24x32xf32> to vector<24xf32>
    %113 = vector.shape_cast %112 : vector<24xf32> to vector<24x1xf32>
    %cst_61 = arith.constant 3.200000e+01 : f32
    %114 = vector.broadcast %cst_61 : f32 to vector<24x1xf32>
    %115 = arith.divf %113, %114 : vector<24x1xf32>
    %cst_62 = arith.constant 9.99999974E-6 : f32
    %116 = vector.broadcast %cst_62 : f32 to vector<24x1xf32>
    %117 = arith.addf %115, %116 : vector<24x1xf32>
    %118 = math.rsqrt %117 : vector<24x1xf32>
    %119 = vector.broadcast %118 : vector<24x1xf32> to vector<24x32xf32>
    %120 = arith.mulf %110, %119 : vector<24x32xf32>
    %121 = vector.broadcast %103 : vector<1x32xf32> to vector<24x32xf32>
    %122 = arith.mulf %120, %121 : vector<24x32xf32>
    %123 = vector.broadcast %104 : vector<1x32xf32> to vector<24x32xf32>
    %124 = arith.addf %122, %123 : vector<24x32xf32>
    %125 = vector.shape_cast %124 : vector<24x32xf32> to vector<3x8x32xf32>
    %126 = arith.truncf %125 : vector<3x8x32xf32> to vector<3x8x32xbf16>
    %c0_63 = arith.constant 0 : index
    %c0_64 = arith.constant 0 : index
    %c0_65 = arith.constant 0 : index
    %127 = vector.load %arg21[%c0_63, %c0_64, %c0_65] : memref<3x8x32xbf16, #tpu.memory_space<vmem>>, vector<3x8x32xbf16>
    tpu.vector_store %arg21[%c0_63, %c0_64, %c0_65], %126 {strides = array<i32>} : memref<3x8x32xbf16, #tpu.memory_space<vmem>>, vector<3x8x32xbf16>,
    return
  }
  func.func @transform_0(%arg0: i32) -> (i32, i32, i32) {
    %c0_i32 = arith.constant 0 : i32
    %c0_i32_0 = arith.constant 0 : i32
    %c0_i32_1 = arith.constant 0 : i32
    return %arg0, %c0_i32, %c0_i32_0 : i32, i32, i32
  }
  func.func @transform_1(%arg0: i32) -> (i32, i32, i32) {
    %c0_i32 = arith.constant 0 : i32
    %c0_i32_0 = arith.constant 0 : i32
    %c0_i32_1 = arith.constant 0 : i32
    return %arg0, %c0_i32, %c0_i32_0 : i32, i32, i32
  }
  func.func @transform_2(%arg0: i32) -> (i32, i32) {
    %c0_i32 = arith.constant 0 : i32
    %c0_i32_0 = arith.constant 0 : i32
    %c0_i32_1 = arith.constant 0 : i32
    return %c0_i32, %c0_i32_0 : i32, i32
  }
  func.func @transform_3(%arg0: i32) -> (i32, i32) {
    %c0_i32 = arith.constant 0 : i32
    %c0_i32_0 = arith.constant 0 : i32
    %c0_i32_1 = arith.constant 0 : i32
    return %c0_i32, %c0_i32_0 : i32, i32
  }
  func.func @transform_4(%arg0: i32) -> (i32, i32) {
    %c0_i32 = arith.constant 0 : i32
    %c0_i32_0 = arith.constant 0 : i32
    %c0_i32_1 = arith.constant 0 : i32
    return %c0_i32, %c0_i32_0 : i32, i32
  }
  func.func @transform_5(%arg0: i32) -> (i32, i32) {
    %c0_i32 = arith.constant 0 : i32
    %c0_i32_0 = arith.constant 0 : i32
    %c0_i32_1 = arith.constant 0 : i32
    return %c0_i32, %c0_i32_0 : i32, i32
  }
  func.func @transform_6(%arg0: i32) -> (i32, i32) {
    %c0_i32 = arith.constant 0 : i32
    %c0_i32_0 = arith.constant 0 : i32
    %c0_i32_1 = arith.constant 0 : i32
    return %c0_i32, %c0_i32_0 : i32, i32
  }
  func.func @transform_7(%arg0: i32) -> (i32, i32) {
    %c0_i32 = arith.constant 0 : i32
    %c0_i32_0 = arith.constant 0 : i32
    %c0_i32_1 = arith.constant 0 : i32
    return %c0_i32, %c0_i32_0 : i32, i32
  }
  func.func @transform_8(%arg0: i32) -> (i32, i32) {
    %c0_i32 = arith.constant 0 : i32
    %c0_i32_0 = arith.constant 0 : i32
    %c0_i32_1 = arith.constant 0 : i32
    return %c0_i32, %c0_i32_0 : i32, i32
  }
  func.func @transform_9(%arg0: i32) -> (i32, i32) {
    %c0_i32 = arith.constant 0 : i32
    %c0_i32_0 = arith.constant 0 : i32
    %c0_i32_1 = arith.constant 0 : i32
    return %c0_i32, %c0_i32_0 : i32, i32
  }
  func.func @transform_10(%arg0: i32) -> (i32, i32) {
    %c0_i32 = arith.constant 0 : i32
    %c0_i32_0 = arith.constant 0 : i32
    %c0_i32_1 = arith.constant 0 : i32
    return %c0_i32, %c0_i32_0 : i32, i32
  }
  func.func @transform_11(%arg0: i32) -> (i32, i32) {
    %c0_i32 = arith.constant 0 : i32
    %c0_i32_0 = arith.constant 0 : i32
    %c0_i32_1 = arith.constant 0 : i32
    return %c0_i32, %c0_i32_0 : i32, i32
  }
  func.func @transform_12(%arg0: i32) -> (i32, i32) {
    %c0_i32 = arith.constant 0 : i32
    %c0_i32_0 = arith.constant 0 : i32
    %c0_i32_1 = arith.constant 0 : i32
    return %c0_i32, %c0_i32_0 : i32, i32
  }
  func.func @transform_13(%arg0: i32) -> (i32, i32) {
    %c0_i32 = arith.constant 0 : i32
    %c0_i32_0 = arith.constant 0 : i32
    %c0_i32_1 = arith.constant 0 : i32
    return %c0_i32, %c0_i32_0 : i32, i32
  }
  func.func @transform_14(%arg0: i32) -> (i32, i32) {
    %c0_i32 = arith.constant 0 : i32
    %c0_i32_0 = arith.constant 0 : i32
    %c0_i32_1 = arith.constant 0 : i32
    return %c0_i32, %c0_i32_0 : i32, i32
  }
  func.func @transform_15(%arg0: i32) -> (i32, i32) {
    %c0_i32 = arith.constant 0 : i32
    %c0_i32_0 = arith.constant 0 : i32
    %c0_i32_1 = arith.constant 0 : i32
    return %c0_i32, %c0_i32_0 : i32, i32
  }
  func.func @transform_16(%arg0: i32) -> (i32, i32) {
    %c0_i32 = arith.constant 0 : i32
    %c0_i32_0 = arith.constant 0 : i32
    %c0_i32_1 = arith.constant 0 : i32
    return %c0_i32, %c0_i32_0 : i32, i32
  }
  func.func @transform_17(%arg0: i32) -> (i32, i32) {
    %c0_i32 = arith.constant 0 : i32
    %c0_i32_0 = arith.constant 0 : i32
    %c0_i32_1 = arith.constant 0 : i32
    return %c0_i32, %c0_i32_0 : i32, i32
  }
  func.func @transform_18(%arg0: i32) -> (i32, i32) {
    %c0_i32 = arith.constant 0 : i32
    %c0_i32_0 = arith.constant 0 : i32
    %c0_i32_1 = arith.constant 0 : i32
    return %c0_i32, %c0_i32_0 : i32, i32
  }
  func.func @transform_19(%arg0: i32) -> (i32, i32) {
    %c0_i32 = arith.constant 0 : i32
    %c0_i32_0 = arith.constant 0 : i32
    %c0_i32_1 = arith.constant 0 : i32
    return %c0_i32, %c0_i32_0 : i32, i32
  }
  func.func @transform_20(%arg0: i32) -> (i32, i32, i32) {
    %c0_i32 = arith.constant 0 : i32
    %c0_i32_0 = arith.constant 0 : i32
    %c0_i32_1 = arith.constant 0 : i32
    return %arg0, %c0_i32, %c0_i32_0 : i32, i32, i32
  }
}

</mosaic_0001>

<bundles_post_ra>
// kernel: tpu_custom_call.1
= control target key start
LH: loop header
LB: loop body
LE: loop exit
PB: predicated region body
PF: predicated region fallthrough
CT: control target
= control target key end

     0   :  { %s4494_s0 = inlined_call_operand.vmem [shape: bf16[6,8,16], index: 0, kind: input, shape index: {}]   ;;  %s4495_s1 = inlined_call_operand.hbm [shape: f32[6,1,8], index: 1, kind: input, shape index: {}]   ;;  %s4496_s2 = inlined_call_operand.hbm [shape: bf16[16,32], index: 2, kind: input, shape index: {}]   ;;  %s4497_s3 = inlined_call_operand.hbm [shape: f32[1,32], index: 3, kind: input, shape index: {}]   ;;  %s4498_s4 = inlined_call_operand.vmem [shape: bf16[32,32], index: 4, kind: input, shape index: {}]   ;;  %s4499_s5 = inlined_call_operand.hbm [shape: f32[1,32], index: 5, kind: input, shape index: {}]   ;;  %s4500_s6 = inlined_call_operand.hbm [shape: bf16[32,32], index: 6, kind: input, shape index: {}]   ;;  %s4501_s7 = inlined_call_operand.hbm [shape: f32[1,32], index: 7, kind: input, shape index: {}]   ;;  %s4502_s8 = inlined_call_operand.hbm [shape: bf16[32,32], index: 8, kind: input, shape index: {}]   ;;  %s4503_s9 = inlined_call_operand.hbm [shape: f32[1,32], index: 9, kind: input, shape index: {}]   ;;  %s4504_s10 = inlined_call_operand.vmem [shape: bf16[32,32], index: 10, kind: input, shape index: {}]   ;;  %s4505_s11 = inlined_call_operand.vmem [shape: f32[1,32], index: 11, kind: input, shape index: {}]   ;;  %s4506_s12 = inlined_call_operand.vmem [shape: f32[1,32], index: 12, kind: input, shape index: {}]   ;;  %s4507_s13 = inlined_call_operand.vmem [shape: f32[1,32], index: 13, kind: input, shape index: {}]   ;;  %s4508_s14 = inlined_call_operand.hbm [shape: bf16[32,64], index: 14, kind: input, shape index: {}]   ;;  %s4509_s15 = inlined_call_operand.vmem [shape: f32[1,64], index: 15, kind: input, shape index: {}]   ;;  %s4510_s16 = inlined_call_operand.vmem [shape: bf16[64,32], index: 16, kind: input, shape index: {}]   ;;  %s4511_s17 = inlined_call_operand.vmem [shape: f32[1,32], index: 17, kind: input, shape index: {}]   ;;  %s4512_s18 = inlined_call_operand.vmem [shape: f32[1,32], index: 18, kind: input, shape index: {}]   ;;  %s4513_s19 = inlined_call_operand.vmem [shape: f32[1,32], index: 19, kind: input, shape index: {}]   ;;  %s4514_s20 = inlined_call_operand.hbm [shape: bf16[6,8,32], index: 20, kind: output, shape index: {}]  }
   0x1   :  { %4519 = sst [smem:[#allocation24_spill]] %s4494_s0 }
   0x2   :  { %4520 = sst [smem:[#allocation25_spill]] %s4495_s1 }
   0x3   :  { %4521 = sst [smem:[#allocation26_spill]] %s4496_s2 }
   0x4   :  { %4522 = sst [smem:[#allocation27_spill]] %s4497_s3 }
   0x5   :  { %4523 = sst [smem:[#allocation28_spill]] %s4498_s4 }
   0x6   :  { %4524 = sst [smem:[#allocation29_spill]] %s4499_s5 }
   0x7   :  { %4525 = sst [smem:[#allocation30_spill]] %s4500_s6 }
   0x8   :  { %4526 = sst [smem:[#allocation31_spill]] %s4501_s7 }
   0x9   :  { %4527 = sst [smem:[#allocation32_spill]] %s4502_s8 }
   0xa   :  { %4528 = sst [smem:[#allocation33_spill]] %s4503_s9 }
   0xb   :  { %4529 = sst [smem:[#allocation34_spill]] %s4508_s14 }
   0xc   :  { %4530 = sst [smem:[#allocation35_spill]] %s4509_s15 }
   0xd   :  { %4531 = sst [smem:[#allocation36_spill]] %s4510_s16 }
   0xe   :  { %4532 = sst [smem:[#allocation37_spill]] %s4511_s17 }
   0xf   :  { %4533 = sst [smem:[#allocation38_spill]] %s4512_s18 }
  0x10   :  { %4534 = sst [smem:[#allocation39_spill]] %s4513_s19 }
  0x11   :  { %4535 = sst [smem:[#allocation40_spill]] %s4514_s20 }
  0x12   :  { %25 = vsyncpa [#allocation3], 0 }
  0x13   :  { %27 = vsyncpa [#allocation3 + $0x1], 0 }
  0x14   :  { %28 = vsyncpa [#allocation6], 0 }
  0x15   :  { %29 = vsyncpa [#allocation9], 0 }
  0x16   :  { %30 = vsyncpa [#allocation12], 0 }
  0x17   :  { %31 = vsyncpa [#allocation15], 0 }
  0x18   :  { %32 = vsyncpa [#allocation4], 0 }
  0x19   :  { %34 = vsyncpa [#allocation4 + $0x1], 0  ;;  %s3681_s1 = smov 0   ;;  %s3683_s22 = smov 0  }
  0x1a   :  { %s3685_s23 = smov 0   ;;  %s3687_s24 = smov 0  }
  0x1b LB: > { %s4536_s3 = sld [smem:[#allocation26_spill]]  ;;  %s3705_s27 = sadd.s32 4294967295, %s3555_s24   ;;  %s3555_s24 = sphi %s3687_s24, %s4563_s24   ;;  %s3551_s23 = sphi %s3685_s23, %s4562_s23   ;;  %s3547_s22 = sphi %s3683_s22, %s4561_s22   ;;  %s3543_s1 = sphi %s3681_s1, %s4560_s1  }
  0x1c   : > { %p2878_p0 = scmp.ge.s32.totalorder %s3555_s24, 1  ;;  %p87_p1 = scmp.eq.s32.totalorder %s3705_s27, 0 }
  0x1d   : > { %p501_p2 = scmp.lt.s32.totalorder %s3555_s24, 3  ;;  %s3557_s4 = smov [#allocation5]  }
  0x1e   : > { %s514_s29 = sshll.u32 %s3557_s4, 4  ;;  %s4538_s5 = sld [smem:[#allocation29_spill]]  ;;  %s515_s29 = int_to_ptr.vmem [resolvable:$true] %s514_s29 }
  0x1f   : > { %p3710_p3 = pnand %p2878_p0, %p501_p2  ;;  %s4540_s7 = sld [smem:[#allocation31_spill]] }
  0x20   : > { %s3558_s20 = smov [#allocation8]   ;;  %s3559_s18 = smov 64  }
  0x21   : > { %s512_s26 = sshll.u32 %s4536_s3, 4  ;;  %p3049_p4 = pneg %p3710_p3  ;;  %s513_s26 = int_to_ptr.hbm [resolvable:$true] %s512_s26 }
  0x22   : > { %s544_s19 = sshll.u32 %s3558_s20, 4  ;;  %s3560_s17 = smov 4   ;;  %s545_s19 = int_to_ptr.vmem [resolvable:$true] %s544_s19 }
  0x23   : > { %p3722_p6 = pnand %p3049_p4, %p87_p1  ;;  %s4541_s9 = sld [smem:[#allocation33_spill]] }
  0x24   : > { %s542_s21 = sshll.u32 %s4538_s5, 4  ;;  %s3561_s25 = smov [#allocation11]   ;;  %s543_s21 = int_to_ptr.hbm [resolvable:$true] %s542_s21 }
  0x25   : > { %s568_s4 = sshll.u32 %s4540_s7, 4  ;;  %s570_s3 = sshll.u32 %s3561_s25, 4  ;;  %s569_s4 = int_to_ptr.hbm [resolvable:$true] %s568_s4  ;;  %s571_s3 = int_to_ptr.vmem [resolvable:$true] %s570_s3 }
  0x26   : > { %3052 = dma.hbm_to_vmem [thread:$0]  (!%p3722_p6), %s513_s26, 128, %s515_s29, [#allocation6], %s3559_s18, %s3559_s18, %s3560_s17  }
  0x27   : > { %3058 = dma.hbm_to_vmem [thread:$0]  (!%p3722_p6), %s543_s21, 16, %s545_s19, [#allocation9]  }
  0x28   : > { %3064 = dma.hbm_to_vmem [thread:$0]  (!%p3722_p6), %s569_s4, 16, %s571_s3, [#allocation12]  }
  0x29   : > { %s594_s5 = sshll.u32 %s4541_s9, 4  ;;  %s3562_s20 = smov [#allocation14]   ;;  %s595_s5 = int_to_ptr.hbm [resolvable:$true] %s594_s5 }
  0x2a   : > { %s596_s7 = sshll.u32 %s3562_s20, 4  ;;  %s4542_s26 = sld [smem:[#allocation27_spill]]  ;;  %s597_s7 = int_to_ptr.vmem [resolvable:$true] %s596_s7 }
  0x2b   : > { %3070 = dma.hbm_to_vmem [thread:$0]  (!%p3722_p6), %s595_s5, 16, %s597_s7, [#allocation15]  }
  0x2c   : > { %s4543_s6 = sld [smem:[#allocation30_spill]]  ;;  %s3563_s0 = smov [#allocation7]  }
  0x2d   : > { %s529_s25 = sshll.u32 %s3563_s0, 4  ;;  %s3564_s4 = smov [#allocation10]   ;;  %s530_s25 = int_to_ptr.vmem [resolvable:$true] %s529_s25 }
  0x2e   : > { %s555_s15 = sshll.u32 %s3564_s4, 4  ;;  %s4544_s8 = sld [smem:[#allocation32_spill]]  ;;  %s556_s15 = int_to_ptr.vmem [resolvable:$true] %s555_s15 }
  0x2f   : > { %s4545_s14 = sld [smem:[#allocation34_spill]]  ;;  %s3566_s21 = smov [#allocation16]  }
  0x30   : > { %s527_s29 = sshll.u32 %s4542_s26, 4  ;;  %s2877_s0 = sadd.s32 4294967294, %s3555_s24   ;;  %s528_s29 = int_to_ptr.hbm [resolvable:$true] %s527_s29 }
  0x31   : > { %3055 = dma.hbm_to_vmem [thread:$0]  (!%p3722_p6), %s528_s29, 16, %s530_s25, [#allocation6]  }
  0x32   : > { %s553_s30 = sshll.u32 %s4543_s6, 4  ;;  %s3565_s29 = smov [#allocation13]   ;;  %s554_s30 = int_to_ptr.hbm [resolvable:$true] %s553_s30 }
  0x33   : > { %3061 = dma.hbm_to_vmem [thread:$0]  (!%p3722_p6), %s554_s30, 256, %s556_s15, [#allocation9], %s3559_s18, %s3559_s18, %s3560_s17  }
  0x34   : > { %s579_s5 = sshll.u32 %s4544_s8, 4  ;;  %s581_s19 = sshll.u32 %s3565_s29, 4  ;;  %s580_s5 = int_to_ptr.hbm [resolvable:$true] %s579_s5  ;;  %s582_s19 = int_to_ptr.vmem [resolvable:$true] %s581_s19 }
  0x35   : > { %s617_s26 = sshll.u32 %s4545_s14, 4  ;;  %s619_s30 = sshll.u32 %s3566_s21, 4  ;;  %s618_s26 = int_to_ptr.hbm [resolvable:$true] %s617_s26  ;;  %s620_s30 = int_to_ptr.vmem [resolvable:$true] %s619_s30 }
  0x36   : > { %3067 = dma.hbm_to_vmem [thread:$0]  (!%p3722_p6), %s580_s5, 256, %s582_s19, [#allocation12], %s3559_s18, %s3559_s18, %s3560_s17  }
  0x37   : > { %3073 = dma.hbm_to_vmem [thread:$0]  (!%p3722_p6), %s618_s26, 256, %s620_s30, [#allocation15], %s3559_s18, %s3559_s18, %s3560_s17  }
  0x38   : > { %s3774_s25 = sadd.s32 1, %s3555_s24   ;;  %s73_s15 = sadd.s32 1, %s3551_s23 }
  0x39   : > { %s70_s4 = ssub.s32 %s3555_s24, %s3774_s25  ;;  %p80_p8 = scmp.ne.s32.totalorder %s3551_s23, %s3547_s22 }
  0x3a   : > { %p71_p7 = scmp.eq.s32.totalorder %s70_s4, 0  ;;  %p81_p9 = scmp.eq.s32.totalorder %s3555_s24, 0 }
  0x3b   : > { %p86_p10 = scmp.ne.s32.totalorder %s3547_s22, %s3543_s1  ;;  %p488_p13 = scmp.eq.s32.totalorder %s3705_s27, 1 }
  0x3c   : > { %s3785_s16 = scalar_select %p71_p7, %s3551_s23, %s73_s15  }
  0x3d   : > { %p82_p11 = por %p81_p9, %p80_p8  ;;  %p3789_p12 = por %p87_p1, %p86_p10 }
  0x3e   : > { %p494_p0 = scmp.eq.s32.totalorder %s2877_s0, 1  ;;  %p3090_p2 = scmp.lt.s32.totalorder %s3555_s24, 2 }
  0x3f   : > { %s657_s17 = sand.u32 1, %s3551_s23   ;;  %p3796_p4 = por %p488_p13, %p80_p8 }
  0x40   : > { %p3800_p6 = por %p494_p0, %p86_p10  ;;  %s3010_s5 = smul.u32 3, %s657_s17 }
  0x41   : > { %s662_s7 = smul.u32 3, %s3555_s24  ;;  %p3805_p7 = pnand %p3090_p2, %p82_p11 }
  0x42   : > { %s4550_s19 = sld [smem:[#allocation25_spill]]  ;;  %s661_s30 = scalar_lea.vmem [#allocation2], %s3010_s5 }
  0x43   : > { %s668_s0 = sshll.u32 %s661_s30, 4  ;;  %s658_s15 = scalar_lea.sflag [#allocation3], %s657_s17  ;;  %s669_s0 = int_to_ptr.vmem [resolvable:$true] %s668_s0 }
  0x44   : > { %p3447_p9 = pneg %p3805_p7 }
  0x48   : > { %s665_s21 = scalar_lea.hbm %s4550_s19, %s662_s7  ;;  %s3450_s26 = scalar_lea.hbm %s4550_s19, 6 }
  0x49   : > { %s666_s4 = sshll.u32 %s665_s21, 4  ;;  %s667_s4 = int_to_ptr.hbm [resolvable:$true] %s666_s4 }
  0x4a   : > { %s3443_s6 = sshra.s32 %s667_s4, 4  ;;  %s3444_s6 = int_to_ptr.hbm [resolvable:$true] %s3443_s6 }
  0x4b   : > { %s3445_s8 = scalar_lea.hbm %s3444_s6, 3  ;;  %p3451_p13 = scmp.lt.s32.totalorder %s3444_s6, %s4550_s19 }
  0x4c   : > { %p3446_p8 = scmp.ne.s32.totalorder %s3444_s6, %s3445_s8  ;;  %p3452_p0 = scmp.lt.s32.totalorder %s3450_s26, %s3445_s8 }
  0x4e   : > { %p3448_p10 = pnand %p3447_p9, %p3446_p8  ;;  %p3453_p2 = por %p3452_p0, %p3451_p13 }
  0x50   : > { %p3449_p11 = pneg %p3448_p10 }
  0x52   : > { %p3454_p5 = pnand %p3453_p2, %p3449_p11 }
  0x54   : > { %3457 = shalt.err (!%p3454_p5)
}
  0x55   : > { %s3567_s17 = smov 16   ;;  %s3568_s5 = smov 1  }
  0x56   : > { %3077 = dma.hbm_to_vmem [thread:$0]  (!%p3805_p7), %s667_s4, 48, %s669_s0, %s658_s15, %s3567_s17, %s3567_s17, %s3568_s5  }
  0x57   : > { %680 = sbr.rel (%p3710_p3) target bundleno = 2192 (0x890), region = 100  ;;  %s3825_s9 = sand.u32 (!%p3710_p3), 1, %s3547_s22  }
  0x58   : > { %s3011_s14 = smul.u32 (!%p3710_p3), 3, %s3825_s9  ;;  %s683_s6 = scalar_lea.sflag (!%p3710_p3), [#allocation3], %s3825_s9 }
  0x5a   : > { %s3829_s8 = scalar_lea.vmem (!%p3710_p3), [#allocation2], %s3011_s14 }
  0x5c   : > { %3518 = dma.done.wait (%p3789_p12), %s683_s6, 48  }
  0x5d   : > { %3520 = vsyncadd (%p3789_p12), %s683_s6, 4294967248 }
  0x5e   : > { %3522 = dma.done.wait (%p87_p1), [#allocation6], 144  }
  0x5f   : > { %3524 = vsyncadd (%p87_p1), [#allocation6], 4294967152 }
  0x60   : > { %3526 = dma.done.wait (%p87_p1), [#allocation9], 272  }
  0x61   : > { %3528 = vsyncadd (%p87_p1), [#allocation9], 4294967024 }
  0x62   : > { %3530 = dma.done.wait (%p87_p1), [#allocation12], 272  }
  0x63   : > { %3532 = vsyncadd (%p87_p1), [#allocation12], 4294967024 }
  0x64   : > { %3534 = dma.done.wait (%p87_p1), [#allocation15], 272  }
  0x65   : > { %3536 = vsyncadd (%p87_p1), [#allocation15], 4294967024  ;;  %s789_s28 = smul.u32 3, %s3705_s27  ;;  %v2992_v0 = vld [vmem:[#allocation5] sm:$0xff]  ;;  %s4551_s30 = sld [smem:[#allocation24_spill]]  ;;  %vm824_vm0 = vcmask 130048  }
  0x66   : > { %838 = vmatpush.bf16.msra.mxu0 %v2992_v0  ;;  %s4552_s26 = sld [smem:[#allocation28_spill]]  ;;  %v2996_v6 = vld [vmem:[#allocation10 + $0x8] sm:$0xff]  ;;  %v2995_v8 = vld [vmem:[#allocation10] sm:$0xff]  ;;  %v2997_v10 = vld [vmem:[#allocation13] sm:$0xff]  ;;  %vm871_vm1 = vcmask 261120   ;;  %s3569_s17 = smov 112  }
  0x67   : > { %p790_p3 = scmp.lt.s32.totalorder %s789_s28, 5  ;;  %922 = vmatpush.bf16.msra.mxu2 %v2996_v6  ;;  %v2998_v9 = vld [vmem:[#allocation13 + $0x8] sm:$0xff]  ;;  %v3153_v25 = vld [vmem:[#allocation11] ss:$0 sm:$0xff]  ;;  %v3570_v47 = vmov 1983009808  }
  0x68   : > { %v3151_v12 = vld [vmem:[#allocation7] ss:$0 sm:$0xff]  ;;  %v3152_v21 = vld [vmem:[#allocation8] ss:$0 sm:$0xff]  ;;  %v1004_v48 = vunpack.c.l.s4 %v3570_v47  ;;  %v3571_v55 = vmov 1934713408  }
  0x69   : > { %s4565_s28 = smov (!%p790_p3, %s789_s28), 5  ;;  %v1011_v56 = vunpack.c.l.s4 %v3571_v55  ;;  %vm1008_vm2 = vcmask 1047556   ;;  %vm1900_vm3 = vcmask 64512   ;;  %vm1976_vm4 = vcmask 1043456   ;;  %s4553_s7 = sld [smem:[#allocation36_spill]] }
  0x6a   : > { %s2897_s2 = sshll.u32 %s4565_s28, 2  ;;  %v3903_v49 = vunpack.c.0.s8 %v1004_v48  ;;  %s3572_s28 = smov 16   ;;  %vm2585_vm15 = vcmask 523264  }
  0x6b   : > { %s793_s0 = scalar_lea.vmem %s4551_s30, %s2897_s2  ;;  %923 = vmatpush.bf16.msra.mxu2 %v2995_v8  ;;  %s4554_s21 = sld [smem:[#allocation35_spill]] }
  0x6c   : > { %v2991_v1 = vld [vmem:[%s793_s0] sm:$0xff]  ;;  %v800_v2 = vld [vmem:[%s793_s0 + $0x8] sm:$0xf]  ;;  %s4555_s4 = sld [smem:[#allocation37_spill]]  ;;  %s3007_s2 = smul.u32 12, %s3705_s27 }
  0x6d   : > { %2906 = vmatmul.msk.bf16.vlgmr.msra.gmra.mxu0 %vm824_vm0, %v2991_v1  ;;  %v815_v3 = vunpack.c.l.b16 %v800_v2  ;;  %v2994_v5 = vld [vmem:[%s4552_s26 + $0x8] sm:$0xff]  ;;  %v2993_v7 = vld [vmem:[%s4552_s26] sm:$0xff]  ;;  %v3907_v1 = vunpack.c.0.s8 %v1011_v56  ;;  %s4557_s6 = sld [smem:[#allocation39_spill]]  ;;  %s2701_s27 = scalar_lea.sflag [#allocation4], %s3825_s9 }
  0x6e   : > { %884 = vmatpush.bf16.msra.mxu1 %v2994_v5  ;;  %3008 = vmatpush.bf16.msra.mxu3 %v2994_v5  ;;  %s4558_s30 = sld [smem:[#allocation40_spill]] }
  0x6f   : > { %v817_v4 = vpack.c.b16 %v815_v3, %v815_v3 }
  0x72   : > { %885 = vmatpush.bf16.msra.mxu1 %v2993_v7  ;;  %3009 = vmatpush.bf16.msra.mxu3 %v2993_v7 }
  0x74   : > { %s2712_s0 = scalar_lea.hbm %s4558_s30, %s3007_s2 }
  0x75   : > { %s2715_s15 = sshll.u32 %s2712_s0, 4  ;;  %s2716_s15 = int_to_ptr.hbm [resolvable:$true] %s2715_s15 }
  0x76   : > { %960 = vmatpush.bf16.msrb.mxu3 %v2998_v9  ;;  %s3487_s29 = sshra.s32 %s2716_s15, 4  ;;  %s3488_s29 = int_to_ptr.hbm [resolvable:$true] %s3487_s29 }
  0x77   : > { %p3494_p7 = scmp.lt.s32.totalorder %s3488_s29, %s4558_s30 }
  0x7a   : > { %961 = vmatpush.bf16.msrb.mxu3 %v2997_v10 }
  0x7d   : > { %2907 = vmatmul.msk.bf16.gmra.mxu0 %vm824_vm0, %v817_v4 }
  0xea   : > { %v840_v11 = vpop.f32.mrf.mxu0 }
  0xeb   : > { %v3863_v14 = vadd.f32 %v3151_v12, %v840_v11 }
  0xf2   : > { %v842_v13 = vpop.f32.mrf.mxu0 }
  0xf3   : > { %v3865_v15 = vadd.f32 %v3151_v12, %v842_v13 }
  0xf5   : > { %v849_v16 = vpack.c.bf16 %v3865_v15, %v3863_v14 }
  0xf7   : > { %2916 = vmatmul.msk.bf16.vlgmr.msra.gmra.mxu1 %vm871_vm1, %v849_v16  ;;  %2926 = vmatmul.msk.bf16.vlgmr.msra.gmra.mxu2 %vm871_vm1, %v849_v16 }
  0xfa   : > { %v845_v17 = vpop.f32.mrf.mxu0 }
  0xfb   : > { %v3871_v18 = vadd.f32 %v3151_v12, %v845_v17 }
  0xfd   : > { %v850_v19 = vpack.c.bf16 %v3871_v18, %v3871_v18 }
  0xff   : > { %2917 = vmatmul.msk.bf16.vlgmr.msra.gmra.mxu3 %vm871_vm1, %v850_v19 }
 0x102   : > { %v847_v20 = vpop.f32.mrf.mxu0 }
 0x107   : > { %2927 = vmatmul.msk.bf16.gmra.mxu2 %vm871_vm1, %v850_v19 }
 0x10f   : > { %2936 = vmatmul.msk.bf16.vlgmr.msrb.gmra.mxu3 %vm871_vm1, %v849_v16 }
 0x11f   : > { %2937 = vmatmul.msk.bf16.gmra.mxu3 %vm871_vm1, %v850_v19 }
 0x174   : > { %v887_v22 = vpop.f32.mrf.mxu1 }
 0x175   : > { %v888_v23 = vadd.f32 %v3152_v21, %v887_v22 }
 0x177   : > { %v972_v24 = vpack.c.bf16 %v888_v23, %v888_v23 }
 0x179   : > { %978 = vrot.lane.b32.xlu1 %v972_v24, %s3569_s17  ;;  %v987_v54 = vshrl.u32 %v972_v24, 16 }
 0x17a   : > { %v925_v26 = vpop.f32.mrf.mxu2 }
 0x17b   : > { %v926_v27 = vadd.f32 %v3153_v25, %v925_v26 }
 0x17c   : > { %v889_v28 = vpop.f32.mrf.mxu1 }
 0x17d   : > { %v3880_v29 = vpack.c.bf16 %v926_v27, %v926_v27  ;;  %v890_v30 = vadd.f32 %v3152_v21, %v889_v28 }
 0x17f   : > { %v3882_v31 = vpack.c.bf16 %v890_v30, %v890_v30  ;;  %1243 = vrot.lane.b32.xlu0 %v3880_v29, %s3569_s17 }
 0x181   : > { %980 = vrot.lane.b32.xlu1 %v3882_v31, %s3569_s17 }
 0x182   : > { %v892_v32 = vpop.f32.mrf.mxu3  ;;  %v927_v33 = vpop.f32.mrf.mxu2 }
 0x183   : > { %v928_v34 = vadd.f32 %v3153_v25, %v927_v33  ;;  %v893_v40 = vadd.f32 %v3152_v21, %v892_v32 }
 0x185   : > { %v3888_v35 = vpack.c.bf16 %v928_v34, %v928_v34  ;;  %v3895_v43 = vpack.c.bf16 %v893_v40, %v893_v40 }
 0x187   : > { %1245 = vrot.lane.b32.xlu0 %v3888_v35, %s3569_s17  ;;  %v999_v34 = vshrl.u32 %v3895_v43, 16 }
 0x18a   : > { %v894_v36 = vpop.f32.mrf.mxu3  ;;  %v930_v37 = vpop.f32.mrf.mxu2 }
 0x18b   : > { %v931_v38 = vadd.f32 %v3153_v25, %v930_v37  ;;  %v993_v25 = vshrl.u32 %v3882_v31, 16  ;;  %v1258_v36 = vshrl.u32 %v3888_v35, 16 }
 0x18d   : > { %v1239_v39 = vpack.c.bf16 %v931_v38, %v931_v38 }
 0x18f   : > { %1247 = vrot.lane.b32.xlu2 %v1239_v39, %s3569_s17  ;;  %v1264_v51 = vshrl.u32 %v1239_v39, 16 }
 0x192   : > { %v3893_v41 = vpop.f32.mrf.mxu3  ;;  %v932_v42 = vpop.f32.mrf.mxu2 }
 0x197   : > { %982 = vrot.lane.b32.xlu2 %v3895_v43, %s3569_s17 }
 0x19a   : > { %v3899_v44 = vpop.f32.mrf.mxu3 }
 0x1a2   : > { %v3901_v45 = vpop.f32.mrf.mxu3 }
 0x1aa   : > { %v970_v46 = vpop.f32.mrf.mxu3 }
 0x1e9   : > { %v1248_v50 = vpop.permute.xlu2 %1247 }
 0x1ea   : > { %v1263_v52 = vpack.i.b16 %v1248_v50, %v1239_v39  ;;  %v1265_v53 = vshrl.u32 %v1248_v50, 16 }
 0x1eb   : > { %v979_v57 = vpop.permute.xlu1 %978 }
 0x1ec   : > { %v1266_v58 = vpack.i.b16 %v1265_v53, %v1264_v51  ;;  %v1347_v59 = vperm.slane %v1263_v52, %v3903_v49  ;;  %v986_v60 = vpack.i.b16 %v979_v57, %v972_v24  ;;  %v988_v61 = vshrl.u32 %v979_v57, 16 }
 0x1ed   : > { %v1252_v24 = vshrl.u32 %v3880_v29, 16 }
 0x1ee   : > { %v1348_v62 = vrot.slane %v1347_v59, 4  ;;  %v1366_v63 = vperm.slane %v1266_v58, %v3903_v49  ;;  %v989_v0 = vpack.i.b16 %v988_v61, %v987_v54  ;;  %v1006_v2 = vperm.slane %v986_v60, %v3903_v49 }
 0x1ef   : > { %v1353_v9 = vperm.slane %v1347_v59, %v3907_v1 }
 0x1f0   : > { %v1349_v3 = vsel %vm1008_vm2, 0, %v1348_v62  ;;  %v1367_v4 = vrot.slane %v1366_v63, 4  ;;  %v1007_v6 = vrot.slane %v1006_v2, 4  ;;  %v1026_v7 = vperm.slane %v989_v0, %v3903_v49 }
 0x1f1   : > { %v1357_v5 = vperm.slane %v1349_v3, %v3907_v1  ;;  %v1372_v10 = vperm.slane %v1366_v63, %v3907_v1  ;;  %v983_v12 = vpop.permute.xlu2 %982  ;;  %v1013_v16 = vperm.slane %v1006_v2, %v3907_v1  ;;  %v1358_v27 = vrot.slane %v1353_v9, 4  ;;  %v1244_v33 = vpop.permute.xlu0 %1243 }
 0x1f2   : > { %v1368_v8 = vsel %vm1008_vm2, 0, %v1367_v4  ;;  %v1009_v11 = vsel %vm1008_vm2, 0, %v1007_v6  ;;  %v1027_v19 = vrot.slane %v1026_v7, 4  ;;  %v998_v23 = vpack.i.b16 %v983_v12, %v3895_v43 }
 0x1f3   : > { %v1360_v13 = vrot.slane %v1357_v5, 4  ;;  %v1017_v17 = vperm.slane %v1009_v11, %v3907_v1  ;;  %v1376_v20 = vperm.slane %v1368_v8, %v3907_v1  ;;  %v1377_v30 = vrot.slane %v1372_v10, 4  ;;  %v981_v3 = vpop.permute.xlu1 %980 }
 0x1f4   : > { %v1028_v22 = vsel %vm1008_vm2, 0, %v1027_v19  ;;  %v1018_v32 = vrot.slane %v1013_v16, 4  ;;  %v1032_v38 = vperm.slane %v1026_v7, %v3907_v1  ;;  %v1000_v42 = vshrl.u32 %v983_v12, 16 }
 0x1f5   : > { %v1020_v21 = vrot.slane %v1017_v17, 4  ;;  %v1036_v26 = vperm.slane %v1028_v22, %v3907_v1  ;;  %v1361_v28 = vsel %vm1008_vm2, 0, %v1360_v13  ;;  %v1379_v37 = vrot.slane %v1376_v20, 4 }
 0x1f6   : > { %v1083_v46 = vperm.slane %v998_v23, %v3903_v49  ;;  %v3932_v47 = vsel %vm1008_vm2, %v1360_v13, %v1353_v9  ;;  %v1454_v48 = vrot.slane %v1361_v28, 4  ;;  %v1251_v50 = vpack.i.b16 %v1244_v33, %v3880_v29 }
 0x1f7   : > { %v1021_v39 = vsel %vm1008_vm2, 0, %v1020_v21  ;;  %v1039_v40 = vrot.slane %v1036_v26, 4  ;;  %v1253_v51 = vshrl.u32 %v1244_v33, 16  ;;  %v1359_v43 = vsel %vm1008_vm2, 0, %v1358_v27 }
 0x1f8   : > { %v1378_v52 = vsel %vm1008_vm2, 0, %v1377_v30  ;;  %v1019_v53 = vsel %vm1008_vm2, 0, %v1018_v32  ;;  %v1001_v54 = vpack.i.b16 %v1000_v42, %v999_v34  ;;  %v1380_v55 = vsel %vm1008_vm2, 0, %v1379_v37 }
 0x1f9   : > { %v1122_v56 = vrot.slane %v1021_v39, 4  ;;  %v1084_v57 = vrot.slane %v1083_v46, 4  ;;  %v1254_v58 = vpack.i.b16 %v1253_v51, %v1252_v24  ;;  %v1453_v59 = vperm.slane %v3932_v47, %v3903_v49 }
 0x1fa   : > { %v1040_v60 = vsel %vm1008_vm2, 0, %v1039_v40  ;;  %v1102_v29 = vperm.slane %v1001_v54, %v3903_v49  ;;  %v1271_v61 = vperm.slane %v1251_v50, %v3903_v49  ;;  %v3945_v62 = vsel %vm1008_vm2, %v1454_v48, %v1359_v43 }
 0x1fb   : > { %v3948_v63 = vsel %vm1008_vm2, %v1379_v37, %v1372_v10  ;;  %v1037_v0 = vrot.slane %v1032_v38, 4  ;;  %v1085_v2 = vsel %vm1008_vm2, 0, %v1084_v57  ;;  %v1471_v4 = vrot.slane %v1380_v55, 4 }
 0x1fc   : > { %v1093_v5 = vperm.slane %v1085_v2, %v3907_v1  ;;  %v1103_v6 = vrot.slane %v1102_v29, 4  ;;  %v1272_v7 = vrot.slane %v1271_v61, 4  ;;  %v1123_v8 = vsel %vm1008_vm2, %v1122_v56, %v1019_v53 }
 0x1fd   : > { %v1139_v9 = vrot.slane %v1040_v60, 4  ;;  %v3954_v11 = vperm.slane %v1083_v46, %v3907_v1  ;;  %v1290_v12 = vperm.slane %v1254_v58, %v3903_v49  ;;  %v3959_v13 = vperm.slane %v1102_v29, %v3907_v1 }
 0x1fe   : > { %v1104_v10 = vsel %vm1008_vm2, 0, %v1103_v6  ;;  %v1273_v17 = vsel %vm1008_vm2, 0, %v1272_v7  ;;  %v994_v19 = vshrl.u32 %v981_v3, 16  ;;  %v3963_v20 = vsel %vm1008_vm2, %v1020_v21, %v1013_v16 }
 0x1ff   : > { %v1112_v22 = vperm.slane %v1104_v10, %v3907_v1  ;;  %v1277_v23 = vperm.slane %v1271_v61, %v3907_v1  ;;  %v1291_v24 = vrot.slane %v1290_v12, 4  ;;  %v1038_v26 = vsel %vm1008_vm2, 0, %v1037_v0 }
 0x200   : > { %v3969_v27 = vsel %vm1008_vm2, %v1039_v40, %v1032_v38  ;;  %v3971_v28 = vrot.slane %v1093_v5, 4  ;;  %v1281_v30 = vperm.slane %v1273_v17, %v3907_v1  ;;  %v1127_v32 = vperm.slane %v1123_v8, %v3903_v49 }
 0x201   : > { %v3976_v33 = vsel %vm1008_vm2, %v1139_v9, %v1038_v26  ;;  %v1094_v16 = vrot.slane %v3954_v11, 4  ;;  %v992_v21 = vpack.i.b16 %v981_v3, %v3882_v31  ;;  %v1113_v34 = vrot.slane %v3959_v13, 4 }
 0x202   : > { %v3981_v37 = vrot.slane %v1112_v22, 4  ;;  %v1292_v38 = vsel %vm1008_vm2, 0, %v1291_v24  ;;  %v995_v39 = vpack.i.b16 %v994_v19, %v993_v25  ;;  %v1459_v40 = vperm.slane %v3945_v62, %v3903_v49  ;;  %v1246_v25 = vpop.permute.xlu0 %1245 }
 0x203   : > { %v3989_v42 = vsel %vm1008_vm2, %v1471_v4, %v1378_v52  ;;  %v1121_v46 = vperm.slane %v3963_v20, %v3903_v49  ;;  %v1282_v48 = vrot.slane %v1277_v23, 4  ;;  %v1138_v50 = vperm.slane %v3969_v27, %v3903_v49 }
 0x204   : > { %v3997_v51 = vsel %vm1008_vm2, 0, %v3971_v28  ;;  %v1284_v43 = vrot.slane %v1281_v30, 4  ;;  %v4000_v31 = vperm.slane %v1290_v12, %v3907_v1  ;;  %v4002_v53 = vrot.slane %v1127_v32, 4 }
 0x205   : > { %v1144_v52 = vperm.slane %v3976_v33, %v3903_v49  ;;  %v4007_v54 = vsel %vm1008_vm2, 0, %v1094_v16  ;;  %v1300_v55 = vperm.slane %v1292_v38, %v3907_v1  ;;  %v1114_v56 = vsel %vm1008_vm2, 0, %v1113_v34 }
 0x206   : > { %v1116_v57 = vsel %vm1008_vm2, 0, %v3981_v37  ;;  %v1045_v58 = vperm.slane %v992_v21, %v3903_v49  ;;  %v1064_v60 = vperm.slane %v995_v39, %v3903_v49  ;;  %v1190_v29 = vrot.slane %v3997_v51, 4 }
 0x207   : > { %v1283_v61 = vsel %vm1008_vm2, 0, %v1282_v48  ;;  %v1257_v0 = vpack.i.b16 %v1246_v25, %v3888_v35  ;;  %v1259_v2 = vshrl.u32 %v1246_v25, 16  ;;  %v1285_v3 = vsel %vm1008_vm2, 0, %v1284_v43 }
 0x208   : > { %v1301_v4 = vrot.slane %v4000_v31, 4  ;;  %v1046_v5 = vrot.slane %v1045_v58, 4  ;;  %v1065_v6 = vrot.slane %v1064_v60, 4  ;;  %v1207_v7 = vrot.slane %v1116_v57, 4 }
 0x209   : > { %v1303_v8 = vrot.slane %v1300_v55, 4  ;;  %v1260_v9 = vpack.i.b16 %v1259_v2, %v1258_v36  ;;  %v1309_v12 = vperm.slane %v1257_v0, %v3903_v49  ;;  %v1051_v17 = vperm.slane %v1045_v58, %v3907_v1 }
 0x20a   : > { %v1047_v10 = vsel %vm1008_vm2, 0, %v1046_v5  ;;  %v1066_v19 = vsel %vm1008_vm2, 0, %v1065_v6  ;;  %v1070_v22 = vperm.slane %v1064_v60, %v3907_v1  ;;  %v1386_v24 = vrot.slane %v1285_v3, 4 }
 0x20b   : > { %v1055_v26 = vperm.slane %v1047_v10, %v3907_v1  ;;  %v1074_v30 = vperm.slane %v1066_v19, %v3907_v1  ;;  %v1310_v32 = vrot.slane %v1309_v12, 4  ;;  %v1302_v16 = vsel %vm1008_vm2, 0, %v1301_v4 }
 0x20c   : > { %v1381_v35 = vsel %vm1008_vm2, %v1284_v43, %v1277_v23  ;;  %v1315_v36 = vperm.slane %v1309_v12, %v3907_v1  ;;  %v1328_v21 = vperm.slane %v1260_v9, %v3903_v49  ;;  %v1304_v34 = vsel %vm1008_vm2, 0, %v1303_v8 }
 0x20d   : > { %v1058_v38 = vrot.slane %v1055_v26, 4  ;;  %v1077_v39 = vrot.slane %v1074_v30, 4  ;;  %v1311_v48 = vsel %vm1008_vm2, 0, %v1310_v32  ;;  %v1056_v25 = vrot.slane %v1051_v17, 4 }
 0x20e   : > { %v1075_v55 = vrot.slane %v1070_v22, 4  ;;  %v1319_v57 = vperm.slane %v1311_v48, %v3907_v1  ;;  %v1329_v58 = vrot.slane %v1328_v21, 4  ;;  %v1320_v23 = vrot.slane %v1315_v36, 4 }
 0x20f   : > { %v1059_v60 = vsel %vm1008_vm2, 0, %v1058_v38  ;;  %v1078_v0 = vsel %vm1008_vm2, 0, %v1077_v39  ;;  %v1387_v43 = vsel %vm1008_vm2, %v1386_v24, %v1283_v61  ;;  %v4040_v2 = vsel %vm1008_vm2, %v1207_v7, %v1114_v56 }
 0x210   : > { %v1403_v3 = vrot.slane %v1304_v34, 4  ;;  %v1156_v4 = vrot.slane %v1059_v60, 4  ;;  %v1173_v5 = vrot.slane %v1078_v0, 4  ;;  %v1322_v6 = vrot.slane %v1319_v57, 4 }
 0x211   : > { %v1330_v9 = vsel %vm1008_vm2, 0, %v1329_v58  ;;  %v1334_v12 = vperm.slane %v1328_v21, %v3907_v1  ;;  %v1385_v10 = vperm.slane %v1381_v35, %v3903_v49  ;;  %v1057_v19 = vsel %vm1008_vm2, 0, %v1056_v25 }
 0x212   : > { %v1076_v26 = vsel %vm1008_vm2, 0, %v1075_v55  ;;  %v1338_v30 = vperm.slane %v1330_v9, %v3907_v1  ;;  %v1391_v61 = vperm.slane %v1387_v43, %v3903_v49  ;;  %v4050_v56 = vsel %vm1008_vm2, %v1058_v38, %v1051_v17 }
 0x213   : > { %v4053_v7 = vsel %vm1008_vm2, %v1077_v39, %v1070_v22  ;;  %v1321_v24 = vsel %vm1008_vm2, 0, %v1320_v23  ;;  %v1323_v32 = vsel %vm1008_vm2, 0, %v1322_v6  ;;  %v1157_v35 = vsel %vm1008_vm2, %v1156_v4, %v1057_v19 }
 0x214   : > { %v1174_v21 = vsel %vm1008_vm2, %v1173_v5, %v1076_v26  ;;  %v1341_v34 = vrot.slane %v1338_v30, 4  ;;  %v1392_v48 = vrot.slane %v1391_v61, 4  ;;  %v1339_v25 = vrot.slane %v1334_v12, 4 }
 0x215   : > { %v1398_v55 = vsel %vm1008_vm2, %v1303_v8, %v4000_v31  ;;  %v1404_v17 = vsel %vm1008_vm2, %v1403_v3, %v1302_v16  ;;  %v1460_v22 = vrot.slane %v1459_v40, 4  ;;  %v1420_v39 = vrot.slane %v1323_v32, 4 }
 0x216   : > { %v1342_v38 = vsel %vm1008_vm2, 0, %v1341_v34  ;;  %v1393_v57 = vsel %vm1008_vm2, %v1392_v48, %v1385_v10  ;;  %v1408_v58 = vperm.slane %v1404_v17, %v3903_v49  ;;  %v1161_v60 = vperm.slane %v1157_v35, %v3903_v49 }
 0x217   : > { %v1178_v0 = vperm.slane %v1174_v21, %v3903_v49  ;;  %v1402_v23 = vperm.slane %v1398_v55, %v3903_v49  ;;  %v1461_v31 = vsel %vm1008_vm2, %v1460_v22, %v1453_v59  ;;  %v1437_v62 = vrot.slane %v1342_v38, 4 }
 0x218   : > { %v1397_v40 = vperm.slane %v1393_v57, %v3907_v1  ;;  %v1409_v8 = vrot.slane %v1408_v58, 4  ;;  %v1476_v16 = vperm.slane %v3989_v42, %v3903_v49  ;;  %v1340_v43 = vsel %vm1008_vm2, 0, %v1339_v25 }
 0x219   : > { %v1415_v3 = vsel %vm1008_vm2, %v1322_v6, %v1315_v36  ;;  %v1470_v4 = vperm.slane %v3948_v63, %v3903_v49  ;;  %v1145_v47 = vrot.slane %v1144_v52, 4  ;;  %v1465_v5 = vperm.slane %v1461_v31, %v3907_v1 }
 0x21a   : > { %v1410_v59 = vsel %vm1008_vm2, %v1409_v8, %v1402_v23  ;;  %v1477_v9 = vrot.slane %v1476_v16, 4  ;;  %v1421_v10 = vsel %vm1008_vm2, %v1420_v39, %v1321_v24  ;;  %v1129_v36 = vsel %vm1008_vm2, %v4002_v53, %v1121_v46 }
 0x21b   : > { %v1414_v42 = vperm.slane %v1410_v59, %v3907_v1  ;;  %v1146_v63 = vsel %vm1008_vm2, %v1145_v47, %v1138_v50  ;;  %v1425_v33 = vperm.slane %v1421_v10, %v3903_v49  ;;  %v1486_v6 = vshrl.u32 %v1397_v40, 16 }
 0x21c   : > { %v1478_v52 = vsel %vm1008_vm2, %v1477_v9, %v1470_v4  ;;  %v1432_v19 = vsel %vm1008_vm2, %v1341_v34, %v1334_v12  ;;  %v1438_v26 = vsel %vm1008_vm2, %v1437_v62, %v1340_v43  ;;  %v1498_v46 = vshrl.u32 %v1465_v5, 16 }
 0x21d   : > { %v1485_v30 = vpack.i.b16 %v1414_v42, %v1397_v40  ;;  %v1482_v20 = vperm.slane %v1478_v52, %v3907_v1  ;;  %v1487_v61 = vshrl.u32 %v1414_v42, 16  ;;  %v1426_v24 = vrot.slane %v1425_v33, 4 }
 0x21e   : > { %v1150_v53 = vperm.slane %v1146_v63, %v3907_v1  ;;  %v1419_v27 = vperm.slane %v1415_v3, %v3903_v49  ;;  %v1442_v50 = vperm.slane %v1438_v26, %v3903_v49  ;;  %v1133_v12 = vperm.slane %v1129_v36, %v3907_v1 }
 0x21f   : > { %v1769_v32 = vsel %vm824_vm0, %v1485_v30, 0  ;;  %v1497_v35 = vpack.i.b16 %v1482_v20, %v1465_v5  ;;  %v1488_v21 = vpack.i.b16 %v1487_v61, %v1486_v6  ;;  %v1499_v48 = vshrl.u32 %v1482_v20, 16 }
 0x220   : > { %1778 = vmatpush.bf16.xpose.msrb.mxu0 %v1769_v32  ;;  %v1427_v34 = vsel %vm1008_vm2, %v1426_v24, %v1419_v27  ;;  %v1436_v25 = vperm.slane %v1432_v19, %v3903_v49  ;;  %v1443_v55 = vrot.slane %v1442_v50, 4  ;;  %v1162_v57 = vrot.slane %v1161_v60, 4  ;;  %v3155_v27 = vld [vmem:[%s3829_s8] ss:$0 sm:$0xff] }
 0x221   : > { %v1845_v17 = vsel %vm824_vm0, %v1497_v35, 0  ;;  %v1788_v22 = vsel %vm824_vm0, %v1488_v21, 0  ;;  %v1500_v38 = vpack.i.b16 %v1499_v48, %v1498_v46  ;;  %v1431_v39 = vperm.slane %v1427_v34, %v3907_v1 }
 0x222   : > { %v1172_v58 = vperm.slane %v4053_v7, %v3903_v49  ;;  %1797 = vmatpush.bf16.xpose.msrb.mxu1 %v1788_v22  ;;  %v1444_v23 = vsel %vm1008_vm2, %v1443_v55, %v1436_v25  ;;  %v1179_v31 = vrot.slane %v1178_v0, 4  ;;  %v1191_v62 = vsel %vm1008_vm2, %v1190_v29, %v4007_v54  ;;  %v3156_v22 = vld [vmem:[%s3829_s8 + $0x1] ss:$0 sm:$0xff] }
 0x223   : > { %v1864_v40 = vsel %vm824_vm0, %v1500_v38, 0  ;;  %v1448_v8 = vperm.slane %v1444_v23, %v3907_v1  ;;  %v1223_v16 = vshrl.u32 %v1150_v53, 16  ;;  %v1212_v60 = vperm.slane %v4040_v2, %v3903_v49 }
 0x224   : > { %v1155_v7 = vperm.slane %v4050_v56, %v3903_v49  ;;  %v1221_v43 = vpack.i.b16 %v1150_v53, %v1133_v12  ;;  %v1180_v0 = vsel %vm1008_vm2, %v1179_v31, %v1172_v58  ;;  %v1492_v4 = vshrl.u32 %v1431_v39, 16  ;;  %v3154_v58 = vld [vmem:[#allocation14] ss:$0 sm:$0xff] }
 0x225   : > { %v1491_v3 = vpack.i.b16 %v1448_v8, %v1431_v39  ;;  %v1493_v51 = vshrl.u32 %v1448_v8, 16  ;;  %v1222_v47 = vshrl.u32 %v1133_v12, 16  ;;  %v1195_v54 = vperm.slane %v1191_v62, %v3903_v49 }
 0x226   : > { %v1202_v29 = vsel %vm1008_vm2, %v3981_v37, %v3959_v13  ;;  %v1163_v59 = vsel %vm1008_vm2, %v1162_v57, %v1155_v7  ;;  %v1184_v9 = vperm.slane %v1180_v0, %v3907_v1  ;;  %v1213_v10 = vrot.slane %v1212_v60, 4  ;;  %v3157_v57 = vld [vmem:[%s3829_s8 + $0x2] ss:$0 sm:$0xff]  ;;  %s3012_s8 = smul.u32 12, %s3825_s9 }
 0x227   : > { %2938 = vmatmul.msk.bf16.vlgmr.msrb.gmra.mxu0 %vm824_vm0, %v1221_v43  ;;  %v1807_v2 = vsel %vm824_vm0, %v1491_v3, 0  ;;  %v1224_v56 = vpack.i.b16 %v1223_v16, %v1222_v47  ;;  %v1494_v5 = vpack.i.b16 %v1493_v51, %v1492_v4  ;;  %v1185_v42 = vsel %vm1008_vm2, %v3971_v28, %v3954_v11 }
 0x228   : > { %1854 = vmatpush.bf16.xpose.msra.mxu0 %v1845_v17  ;;  %1816 = vmatpush.bf16.xpose.msrb.mxu2 %v1807_v2  ;;  %v1167_v37 = vperm.slane %v1163_v59, %v3907_v1  ;;  %v1196_v36 = vrot.slane %v1195_v54, 4  ;;  %v1206_v63 = vperm.slane %v1202_v29, %v3903_v49  ;;  %v1229_v33 = vshrl.u32 %v1184_v9, 16 }
 0x229   : > { %2939 = vmatmul.msk.bf16.vlgmr.msrb.gmra.mxu1 %vm824_vm0, %v1224_v56  ;;  %v1826_v13 = vsel %vm824_vm0, %v1494_v5, 0  ;;  %v1189_v52 = vperm.slane %v1185_v42, %v3903_v49  ;;  %v964_v43 = vadd.f32 %v3154_v58, %v3893_v41  ;;  %v966_v5 = vadd.f32 %v3154_v58, %v3899_v44 }
 0x22a   : > { %1873 = vmatpush.bf16.xpose.msra.mxu1 %v1864_v40  ;;  %1835 = vmatpush.bf16.xpose.msra.mxu3 %v1826_v13  ;;  %v1214_v6 = vsel %vm1008_vm2, %v1213_v10, %v1206_v63  ;;  %v1227_v19 = vpack.i.b16 %v1184_v9, %v1167_v37  ;;  %v1228_v26 = vshrl.u32 %v1167_v37, 16  ;;  %v969_v10 = vadd.f32 %v3154_v58, %v3901_v45 }
 0x22b   : > { %v1197_v11 = vsel %vm1008_vm2, %v1196_v36, %v1189_v52  ;;  %v1218_v30 = vperm.slane %v1214_v6, %v3907_v1  ;;  %v1501_v51 = vpack.c.bf16 %v964_v43, %v964_v43  ;;  %v4169_v9 = vpack.c.bf16 %v966_v5, %v966_v5 }
 0x22c   : > { %v1230_v28 = vpack.i.b16 %v1229_v33, %v1228_v26  ;;  %v1201_v20 = vperm.slane %v1197_v11, %v3907_v1  ;;  %v4174_v42 = vpack.c.bf16 %v969_v10, %v969_v10 }
 0x22d   : > { %v1235_v61 = vshrl.u32 %v1218_v30, 16 }
 0x22e   : > { %v1233_v24 = vpack.i.b16 %v1218_v30, %v1201_v20  ;;  %v1234_v46 = vshrl.u32 %v1201_v20, 16  ;;  %v1516_v20 = vshrl.u32 %v1501_v51, 16 }
 0x22f   : > { %2940 = vmatmul.msk.bf16.vlgmr.msrb.gmra.mxu2 %vm824_vm0, %v1227_v19 }
 0x230   : > { %v1236_v53 = vpack.i.b16 %v1235_v61, %v1234_v46 }
 0x231   : > { %2941 = vmatmul.msk.bf16.vlgmr.msra.gmra.mxu3 %vm824_vm0, %v1230_v28 }
 0x237   : > { %2942 = vmatmul.msk.bf16.vlgmr.msra.gmra.mxu0 %vm824_vm0, %v1233_v24 }
 0x239   : > { %2943 = vmatmul.msk.bf16.vlgmr.msra.gmra.mxu1 %vm824_vm0, %v1236_v53 }
 0x2a4   : > { %v1780_v50 = vpop.f32.mrf.mxu0 }
 0x2a5   : > { %v1879_v32 = vmul.f32 0.25, %v1780_v50 }
 0x2a6   : > { %v1799_v35 = vpop.f32.mrf.mxu1 }
 0x2a7   : > { %v1880_v21 = vmul.f32 0.25, %v1799_v35  ;;  %v1894_v48 = vadd.f32 %v3155_v27, %v1879_v32 }
 0x2a9   : > { %v1901_v12 = vsel %vm1900_vm3, %v1894_v48, -inf  ;;  %v1895_v34 = vadd.f32 %v3155_v27, %v1880_v21 }
 0x2aa   : > { %1902 = vmax.xlane.f32.xlu0 %v1901_v12 }
 0x2ab   : > { %v1904_v25 = vsel %vm1900_vm3, %v1895_v34, -inf }
 0x2ac   : > { %1905 = vmax.xlane.f32.xlu1 %v1904_v25  ;;  %v1782_v55 = vpop.f32.mrf.mxu0 }
 0x2ae   : > { %v1801_v17 = vpop.f32.mrf.mxu1 }
 0x2b2   : > { %v1818_v38 = vpop.f32.mrf.mxu2 }
 0x2b3   : > { %v1881_v39 = vmul.f32 0.25, %v1818_v38 }
 0x2b4   : > { %v1837_v23 = vpop.f32.mrf.mxu3  ;;  %v1856_v31 = vpop.f32.mrf.mxu0 }
 0x2b5   : > { %v1883_v62 = vmul.f32 0.25, %v1856_v31  ;;  %v1896_v40 = vadd.f32 %v3156_v22, %v1881_v39  ;;  %v1882_v16 = vmul.f32 0.25, %v1837_v23 }
 0x2b6   : > { %v1875_v8 = vpop.f32.mrf.mxu1 }
 0x2b7   : > { %v1907_v60 = vsel %vm1900_vm3, %v1896_v40, -inf  ;;  %v4157_v7 = vadd.f32 %v3157_v57, %v1883_v62  ;;  %v1897_v4 = vadd.f32 %v3156_v22, %v1882_v16  ;;  %v1884_v59 = vmul.f32 0.25, %v1875_v8 }
 0x2b8   : > { %1908 = vmax.xlane.f32.xlu2 %v1907_v60 }
 0x2b9   : > { %v1913_v0 = vsel %vm1900_vm3, %v4157_v7, -inf  ;;  %v1910_v2 = vsel %vm1900_vm3, %v1897_v4, -inf  ;;  %v4164_v56 = vadd.f32 %v3157_v57, %v1884_v59 }
 0x2ba   : > { %v1820_v3 = vpop.f32.mrf.mxu2  ;;  %1914 = vmax.xlane.f32.xlu1 %v1913_v0 }
 0x2bb   : > { %v1916_v41 = vsel %vm1900_vm3, %v4164_v56, -inf }
 0x2bc   : > { %v1839_v47 = vpop.f32.mrf.mxu3  ;;  %v1858_v54 = vpop.f32.mrf.mxu0 }
 0x2be   : > { %v1877_v29 = vpop.f32.mrf.mxu1  ;;  %1507 = vrot.lane.b32.xlu0 %v1501_v51, %s3569_s17 }
 0x2c0   : > { %1911 = vmax.xlane.f32.xlu2 %v1910_v2 }
 0x2c8   : > { %1917 = vmax.xlane.f32.xlu2 %v1916_v41 }
 0x2d3   : > { %1509 = vrot.lane.b32.xlu1 %v4169_v9, %s3569_s17 }
 0x2db   : > { %1511 = vrot.lane.b32.xlu1 %v4174_v42, %s3569_s17  ;;  %s4556_s17 = sld [smem:[#allocation38_spill]] }
 0x31d   : > { %v1903_v13 = vpop.xlane.xlu0 %1902 }
 0x31e   : > { %v1919_v37 = vsub.f32 %v1894_v48, %v1903_v13 }
 0x31f   : > { %v1906_v36 = vpop.xlane.xlu1 %1905 }
 0x320   : > { %v1925_v63 = vmul.f32 1.442695, %v1919_v37  ;;  %v1920_v33 = vsub.f32 %v1895_v34, %v1906_v36 }
 0x322   : > { %3165 = vpow2.f32 %v1925_v63  ;;  %v1927_v52 = vmul.f32 1.442695, %v1920_v33 }
 0x324   : > { %3167 = vpow2.f32 %v1927_v52 }
 0x328   : > { %v4178_v44 = vpop.eup %3165 }
 0x329   : > { %v1937_v6 = vsel %vm1900_vm3, %v4178_v44, 0.0 }
 0x32a   : > { %v4182_v19 = vpop.eup %3167  ;;  %1938 = vadd.xlane.f32.xlu2 %v1937_v6 }
 0x32b   : > { %v1909_v45 = vpop.xlane.xlu2 %1908  ;;  %v1940_v26 = vsel %vm1900_vm3, %v4182_v19, 0.0 }
 0x32c   : > { %v1921_v11 = vsub.f32 %v1896_v40, %v1909_v45  ;;  %1941 = vadd.xlane.f32.xlu0 %v1940_v26 }
 0x32d   : > { %v1915_v46 = vpop.xlane.xlu1 %1914 }
 0x32e   : > { %v1929_v28 = vmul.f32 1.442695, %v1921_v11  ;;  %v1923_v12 = vsub.f32 %v4157_v7, %v1915_v46  ;;  %v1522_v11 = vshrl.u32 %v4169_v9, 16 }
 0x330   : > { %3169 = vpow2.f32 %v1929_v28  ;;  %v1508_v30 = vpop.permute.xlu0 %1507  ;;  %v1933_v58 = vmul.f32 1.442695, %v1923_v12 }
 0x331   : > { %v1515_v61 = vpack.i.b16 %v1508_v30, %v1501_v51  ;;  %v1517_v24 = vshrl.u32 %v1508_v30, 16 }
 0x333   : > { %v1518_v53 = vpack.i.b16 %v1517_v24, %v1516_v20  ;;  %v1535_v27 = vperm.slane %v1515_v61, %v3903_v49  ;;  %v1912_v50 = vpop.xlane.xlu2 %1911 }
 0x334   : > { %v1922_v32 = vsub.f32 %v1897_v4, %v1912_v50 }
 0x335   : > { %v1536_v35 = vrot.slane %v1535_v27, 4  ;;  %v1554_v21 = vperm.slane %v1518_v53, %v3903_v49  ;;  %v1541_v34 = vperm.slane %v1535_v27, %v3907_v1 }
 0x336   : > { %v4188_v48 = vpop.eup %3169  ;;  %v1931_v25 = vmul.f32 1.442695, %v1922_v32 }
 0x337   : > { %v1537_v55 = vsel %vm1008_vm2, 0, %v1536_v35  ;;  %v1555_v17 = vrot.slane %v1554_v21, 4  ;;  %v1560_v38 = vperm.slane %v1554_v21, %v3907_v1  ;;  %v1943_v39 = vsel %vm1900_vm3, %v4188_v48, 0.0 }
 0x338   : > { %v1545_v22 = vperm.slane %v1537_v55, %v3907_v1  ;;  %3171 = vpow2.f32 %v1931_v25  ;;  %1944 = vadd.xlane.f32.xlu2 %v1943_v39  ;;  %v1546_v23 = vrot.slane %v1541_v34, 4 }
 0x339   : > { %v1556_v57 = vsel %vm1008_vm2, 0, %v1555_v17  ;;  %v1565_v16 = vrot.slane %v1560_v38, 4  ;;  %3173 = vpow2.f32 %v1933_v58 }
 0x33a   : > { %v1548_v31 = vrot.slane %v1545_v22, 4  ;;  %v1564_v62 = vperm.slane %v1556_v57, %v3907_v1  ;;  %v1547_v3 = vsel %vm1008_vm2, 0, %v1546_v23 }
 0x33b   : > { %v1918_v40 = vpop.xlane.xlu2 %1917  ;;  %v1566_v2 = vsel %vm1008_vm2, 0, %v1565_v16 }
 0x33c   : > { %v1549_v8 = vsel %vm1008_vm2, 0, %v1548_v31  ;;  %v1567_v60 = vrot.slane %v1564_v62, 4  ;;  %v1924_v7 = vsub.f32 %v4164_v56, %v1918_v40  ;;  %v1645_v47 = vsel %vm1008_vm2, %v1548_v31, %v1541_v34 }
 0x33d   : > { %v1650_v43 = vrot.slane %v1549_v8, 4  ;;  %v1649_v10 = vperm.slane %v1645_v47, %v3903_v49  ;;  %v1528_v62 = vshrl.u32 %v4174_v42, 16 }
 0x33e   : > { %v4201_v0 = vpop.eup %3171  ;;  %v1568_v4 = vsel %vm1008_vm2, 0, %v1567_v60  ;;  %v1935_v51 = vmul.f32 1.442695, %v1924_v7  ;;  %v1662_v41 = vsel %vm1008_vm2, %v1567_v60, %v1560_v38 }
 0x33f   : > { %v1651_v54 = vsel %vm1008_vm2, %v1650_v43, %v1547_v3  ;;  %v1667_v29 = vrot.slane %v1568_v4, 4  ;;  %v1946_v59 = vsel %vm1900_vm3, %v4201_v0, 0.0  ;;  %v4215_v36 = vpop.eup %3173  ;;  %v1666_v33 = vperm.slane %v1662_v41, %v3903_v49 }
 0x340   : > { %v1655_v56 = vperm.slane %v1651_v54, %v3903_v49  ;;  %3175 = vpow2.f32 %v1935_v51  ;;  %1947 = vadd.xlane.f32.xlu2 %v1946_v59  ;;  %v1949_v27 = vsel %vm1900_vm3, %v4215_v36, 0.0 }
 0x341   : > { %v1668_v5 = vsel %vm1008_vm2, %v1667_v29, %v1566_v2 }
 0x342   : > { %v1656_v13 = vrot.slane %v1655_v56, 4  ;;  %v1672_v37 = vperm.slane %v1668_v5, %v3903_v49 }
 0x344   : > { %v1657_v63 = vsel %vm1008_vm2, %v1656_v13, %v1649_v10  ;;  %v1673_v52 = vrot.slane %v1672_v37, 4 }
 0x345   : > { %v1510_v6 = vpop.permute.xlu1 %1509  ;;  %v1661_v45 = vperm.slane %v1657_v63, %v3907_v1 }
 0x346   : > { %v4220_v26 = vpop.eup %3175  ;;  %v1521_v28 = vpack.i.b16 %v1510_v6, %v4169_v9  ;;  %v1523_v30 = vshrl.u32 %v1510_v6, 16  ;;  %v1674_v20 = vsel %vm1008_vm2, %v1673_v52, %v1666_v33 }
 0x347   : > { %v1952_v61 = vsel %vm1900_vm3, %v4220_v26, 0.0  ;;  %v1678_v24 = vperm.slane %v1674_v20, %v3907_v1  ;;  %v1750_v32 = vshrl.u32 %v1661_v45, 16 }
 0x348   : > { %v1524_v46 = vpack.i.b16 %v1523_v30, %v1522_v11  ;;  %v1573_v53 = vperm.slane %v1521_v28, %v3903_v49  ;;  %1953 = vadd.xlane.f32.xlu1 %v1952_v61  ;;  %1950 = vadd.xlane.f32.xlu2 %v1949_v27 }
 0x349   : > { %v1749_v50 = vpack.i.b16 %v1678_v24, %v1661_v45  ;;  %v1751_v9 = vshrl.u32 %v1678_v24, 16 }
 0x34a   : > { %v1574_v35 = vrot.slane %v1573_v53, 4  ;;  %v1579_v21 = vperm.slane %v1573_v53, %v3907_v1  ;;  %v1592_v12 = vperm.slane %v1524_v46, %v3903_v49 }
 0x34b   : > { %v1978_v34 = vsel %vm1976_vm4, %v1749_v50, 0  ;;  %v1752_v25 = vpack.i.b16 %v1751_v9, %v1750_v32 }
 0x34c   : > { %v1575_v55 = vsel %vm1008_vm2, 0, %v1574_v35  ;;  %v1593_v17 = vrot.slane %v1592_v12, 4  ;;  %1987 = vmatpush.bf16.msra.mxu2 %v1978_v34  ;;  %v1598_v38 = vperm.slane %v1592_v12, %v3907_v1  ;;  %v1584_v58 = vrot.slane %v1579_v21, 4 }
 0x34d   : > { %v1583_v22 = vperm.slane %v1575_v55, %v3907_v1  ;;  %v1512_v39 = vpop.permute.xlu1 %1511  ;;  %v1997_v57 = vsel %vm1976_vm4, %v1752_v25, 0 }
 0x34e   : > { %v1594_v23 = vsel %vm1008_vm2, 0, %v1593_v17  ;;  %v1527_v31 = vpack.i.b16 %v1512_v39, %v4174_v42  ;;  %2006 = vmatpush.bf16.msrb.mxu3 %v1997_v57  ;;  %v1529_v16 = vshrl.u32 %v1512_v39, 16  ;;  %v1603_v43 = vrot.slane %v1598_v38, 4 }
 0x34f   : > { %v1586_v40 = vrot.slane %v1583_v22, 4  ;;  %v1602_v8 = vperm.slane %v1594_v23, %v3907_v1  ;;  %v1585_v51 = vsel %vm1008_vm2, 0, %v1584_v58 }
 0x350   : > { %v1611_v60 = vperm.slane %v1527_v31, %v3903_v49  ;;  %v1530_v4 = vpack.i.b16 %v1529_v16, %v1528_v62  ;;  %v1604_v10 = vsel %vm1008_vm2, 0, %v1603_v43 }
 0x351   : > { %v1587_v7 = vsel %vm1008_vm2, 0, %v1586_v40  ;;  %v1605_v3 = vrot.slane %v1602_v8, 4  ;;  %v1679_v59 = vsel %vm1008_vm2, %v1586_v40, %v1579_v21 }
 0x352   : > { %v1684_v47 = vrot.slane %v1587_v7, 4  ;;  %v1612_v54 = vrot.slane %v1611_v60, 4  ;;  %v1617_v42 = vperm.slane %v1611_v60, %v3907_v1  ;;  %v1630_v2 = vperm.slane %v1530_v4, %v3903_v49 }
 0x353   : > { %v1606_v29 = vsel %vm1008_vm2, 0, %v1605_v3  ;;  %v1683_v33 = vperm.slane %v1679_v59, %v3903_v49  ;;  %v1696_v20 = vsel %vm1008_vm2, %v1605_v3, %v1598_v38 }
 0x354   : > { %v1685_v56 = vsel %vm1008_vm2, %v1684_v47, %v1585_v51  ;;  %v1701_v41 = vrot.slane %v1606_v29, 4  ;;  %v1613_v5 = vsel %vm1008_vm2, 0, %v1612_v54  ;;  %v1631_v63 = vrot.slane %v1630_v2, 4 }
 0x355   : > { %v1689_v13 = vperm.slane %v1685_v56, %v3903_v49  ;;  %v1621_v37 = vperm.slane %v1613_v5, %v3907_v1  ;;  %v1636_v6 = vperm.slane %v1630_v2, %v3907_v1  ;;  %v1622_v45 = vrot.slane %v1617_v42, 4 }
 0x356   : > { %v1702_v52 = vsel %vm1008_vm2, %v1701_v41, %v1604_v10  ;;  %v1632_v28 = vsel %vm1008_vm2, 0, %v1631_v63  ;;  %v1700_v35 = vperm.slane %v1696_v20, %v3903_v49 }
 0x357   : > { %v1624_v11 = vrot.slane %v1621_v37, 4  ;;  %v1690_v30 = vrot.slane %v1689_v13, 4  ;;  %v1640_v61 = vperm.slane %v1632_v28, %v3907_v1  ;;  %v1706_v24 = vperm.slane %v1702_v52, %v3903_v49 }
 0x358   : > { %v1641_v27 = vrot.slane %v1636_v6, 4  ;;  %v1623_v9 = vsel %vm1008_vm2, 0, %v1622_v45 }
 0x359   : > { %v1625_v46 = vsel %vm1008_vm2, 0, %v1624_v11  ;;  %v1691_v53 = vsel %vm1008_vm2, %v1690_v30, %v1683_v33  ;;  %v1643_v50 = vrot.slane %v1640_v61, 4  ;;  %v1707_v21 = vrot.slane %v1706_v24, 4 }
 0x35a   : > { %v1718_v32 = vrot.slane %v1625_v46, 4  ;;  %v1713_v34 = vsel %vm1008_vm2, %v1624_v11, %v1617_v42  ;;  %v1695_v55 = vperm.slane %v1691_v53, %v3907_v1  ;;  %v1642_v39 = vsel %vm1008_vm2, 0, %v1641_v27 }
 0x35b   : > { %v1644_v12 = vsel %vm1008_vm2, 0, %v1643_v50  ;;  %v1708_v38 = vsel %vm1008_vm2, %v1707_v21, %v1700_v35  ;;  %v1717_v58 = vperm.slane %v1713_v34, %v3903_v49  ;;  %v1730_v23 = vsel %vm1008_vm2, %v1643_v50, %v1636_v6 }
 0x35c   : > { %v1719_v25 = vsel %vm1008_vm2, %v1718_v32, %v1623_v9  ;;  %v1735_v22 = vrot.slane %v1644_v12, 4  ;;  %v1712_v57 = vperm.slane %v1708_v38, %v3907_v1  ;;  %v1756_v8 = vshrl.u32 %v1695_v55, 16 }
 0x35d   : > { %v1723_v17 = vperm.slane %v1719_v25, %v3903_v49  ;;  %v1734_v4 = vperm.slane %v1730_v23, %v3903_v49 }
 0x35e   : > { %v1736_v31 = vsel %vm1008_vm2, %v1735_v22, %v1642_v39  ;;  %v1755_v40 = vpack.i.b16 %v1712_v57, %v1695_v55  ;;  %v1757_v16 = vshrl.u32 %v1712_v57, 16 }
 0x35f   : > { %v1724_v62 = vrot.slane %v1723_v17, 4  ;;  %v1740_v60 = vperm.slane %v1736_v31, %v3903_v49 }
 0x360   : > { %v2016_v43 = vsel %vm1976_vm4, %v1755_v40, 0  ;;  %v1758_v3 = vpack.i.b16 %v1757_v16, %v1756_v8 }
 0x361   : > { %v1725_v7 = vsel %vm1008_vm2, %v1724_v62, %v1717_v58  ;;  %v1741_v51 = vrot.slane %v1740_v60, 4  ;;  %2025 = vmatpush.bf16.msrb.mxu0 %v2016_v43 }
 0x362   : > { %v1729_v47 = vperm.slane %v1725_v7, %v3907_v1  ;;  %v2035_v54 = vsel %vm1976_vm4, %v1758_v3, 0 }
 0x363   : > { %v1742_v29 = vsel %vm1008_vm2, %v1741_v51, %v1734_v4  ;;  %2044 = vmatpush.bf16.msrb.mxu1 %v2035_v54 }
 0x364   : > { %v1746_v59 = vperm.slane %v1742_v29, %v3907_v1  ;;  %v1762_v2 = vshrl.u32 %v1729_v47, 16 }
 0x366   : > { %v1761_v42 = vpack.i.b16 %v1746_v59, %v1729_v47  ;;  %v1763_v56 = vshrl.u32 %v1746_v59, 16 }
 0x368   : > { %v2054_v41 = vsel %vm1976_vm4, %v1761_v42, 0  ;;  %v1764_v5 = vpack.i.b16 %v1763_v56, %v1762_v2 }
 0x369   : > { %2063 = vmatpush.bf16.msrb.mxu2 %v2054_v41 }
 0x36a   : > { %v2073_v10 = vsel %vm1976_vm4, %v1764_v5, 0 }
 0x36b   : > { %2082 = vmatpush.bf16.msra.mxu3 %v2073_v10 }
 0x39d   : > { %v1939_v13 = vpop.xlane.xlu2 %1938 }
 0x39e   : > { %3177 = vrcp.f32 %v1939_v13 }
 0x39f   : > { %v1942_v37 = vpop.xlane.xlu0 %1941 }
 0x3a0   : > { %3179 = vrcp.f32 %v1942_v37 }
 0x3a4   : > { %v3178_v63 = vpop.eup %3177 }
 0x3a5   : > { %v1961_v33 = vmul.f32 %v3178_v63, %v4178_v44 }
 0x3a6   : > { %v3180_v52 = vpop.eup %3179 }
 0x3a7   : > { %v1967_v6 = vpack.c.bf16 %v1961_v33, %v1961_v33  ;;  %v1962_v45 = vmul.f32 %v3180_v52, %v4182_v19 }
 0x3a9   : > { %v1968_v11 = vpack.c.bf16 %v1962_v45, %v1962_v45  ;;  %2944 = vmatmul.msk.bf16.vlgmr.msra.gmra.mxu2 %vm1900_vm3, %v1967_v6 }
 0x3ab   : > { %2945 = vmatmul.msk.bf16.vlgmr.msrb.gmra.mxu3 %vm1900_vm3, %v1968_v11  ;;  %v1945_v28 = vpop.xlane.xlu2 %1944 }
 0x3ac   : > { %3181 = vrcp.f32 %v1945_v28 }
 0x3b2   : > { %v3182_v30 = vpop.eup %3181 }
 0x3b3   : > { %v1963_v20 = vmul.f32 %v3182_v30, %v4188_v48  ;;  %v1948_v61 = vpop.xlane.xlu2 %1947 }
 0x3b4   : > { %3183 = vrcp.f32 %v1948_v61 }
 0x3b5   : > { %v1969_v24 = vpack.c.bf16 %v1963_v20, %v1963_v20 }
 0x3b7   : > { %2946 = vmatmul.msk.bf16.vlgmr.msrb.gmra.mxu0 %vm1900_vm3, %v1969_v24 }
 0x3ba   : > { %v3184_v44 = vpop.eup %3183 }
 0x3bb   : > { %v1954_v46 = vpop.xlane.xlu1 %1953  ;;  %v1964_v53 = vmul.f32 %v3184_v44, %v4201_v0  ;;  %v1951_v19 = vpop.xlane.xlu2 %1950 }
 0x3bc   : > { %3185 = vrcp.f32 %v1954_v46 }
 0x3bd   : > { %3187 = vrcp.f32 %v1951_v19  ;;  %v1970_v27 = vpack.c.bf16 %v1964_v53, %v1964_v53 }
 0x3bf   : > { %2947 = vmatmul.msk.bf16.vlgmr.msrb.gmra.mxu1 %vm1900_vm3, %v1970_v27 }
 0x3c2   : > { %v3186_v50 = vpop.eup %3185 }
 0x3c3   : > { %v3188_v32 = vpop.eup %3187  ;;  %v1966_v9 = vmul.f32 %v3186_v50, %v4220_v26 }
 0x3c4   : > { %v1965_v48 = vmul.f32 %v3188_v32, %v4215_v36 }
 0x3c5   : > { %v1972_v35 = vpack.c.bf16 %v1966_v9, %v1966_v9 }
 0x3c6   : > { %v1971_v21 = vpack.c.bf16 %v1965_v48, %v1965_v48 }
 0x3c7   : > { %2949 = vmatmul.msk.bf16.vlgmr.msra.gmra.mxu3 %vm1900_vm3, %v1972_v35 }
 0x3c8   : > { %2948 = vmatmul.msk.bf16.vlgmr.msrb.gmra.mxu2 %vm1900_vm3, %v1971_v21 }
 0x42c   : > { %v1989_v12 = vpop.f32.mrf.mxu2 }
 0x42d   : > { %v2088_v0 = vpack.c.bf16 %v1989_v12, %v1989_v12 }
 0x42e   : > { %v2008_v34 = vpop.f32.mrf.mxu3 }
 0x42f   : > { %v2089_v25 = vpack.c.bf16 %v2008_v34, %v2008_v34  ;;  %v2097_v55 = vshrl.u32 %v2088_v0, 16 }
 0x431   : > { %v2096_v17 = vpack.i.b16 %v2089_v25, %v2088_v0  ;;  %v2098_v22 = vshrl.u32 %v2089_v25, 16 }
 0x433   : > { %v2099_v38 = vpack.i.b16 %v2098_v22, %v2097_v55  ;;  %v2116_v39 = vperm.slane %v2096_v17, %v3903_v49 }
 0x434   : > { %v1991_v57 = vpop.f32.mrf.mxu2  ;;  %v2027_v58 = vpop.f32.mrf.mxu0 }
 0x435   : > { %v2117_v26 = vrot.slane %v2116_v39, 4  ;;  %v2135_v36 = vperm.slane %v2099_v38, %v3903_v49  ;;  %v2122_v23 = vperm.slane %v2116_v39, %v3907_v1  ;;  %v2090_v51 = vpack.c.bf16 %v2027_v58, %v2027_v58 }
 0x436   : > { %v2010_v31 = vpop.f32.mrf.mxu3 }
 0x437   : > { %v2118_v62 = vsel %vm1008_vm2, 0, %v2117_v26  ;;  %v2136_v40 = vrot.slane %v2135_v36, 4  ;;  %v2141_v8 = vperm.slane %v2135_v36, %v3907_v1  ;;  %v2127_v7 = vrot.slane %v2122_v23, 4 }
 0x438   : > { %v2126_v16 = vperm.slane %v2118_v62, %v3907_v1  ;;  %v2103_v37 = vshrl.u32 %v2090_v51, 16 }
 0x439   : > { %v2137_v60 = vsel %vm1008_vm2, 0, %v2136_v40  ;;  %v2146_v4 = vrot.slane %v2141_v8, 4  ;;  %v2128_v2 = vsel %vm1008_vm2, 0, %v2127_v7 }
 0x43a   : > { %v2129_v43 = vrot.slane %v2126_v16, 4  ;;  %v2145_v3 = vperm.slane %v2137_v60, %v3907_v1 }
 0x43b   : > { %v2147_v5 = vsel %vm1008_vm2, 0, %v2146_v4  ;;  %v3000_v4 = vld [vmem:[%s4504_s10 + $0x8] sm:$0xff] }
 0x43c   : > { %v2130_v47 = vsel %vm1008_vm2, 0, %v2129_v43  ;;  %v2148_v54 = vrot.slane %v2145_v3, 4  ;;  %v2029_v59 = vpop.f32.mrf.mxu0  ;;  %v2046_v42 = vpop.f32.mrf.mxu1  ;;  %v2226_v63 = vsel %vm1008_vm2, %v2129_v43, %v2122_v23  ;;  %2396 = vmatpush.bf16.msra.mxu0 %v3000_v4 }
 0x43d   : > { %v2231_v29 = vrot.slane %v2130_v47, 4  ;;  %v2091_v41 = vpack.c.bf16 %v2046_v42, %v2046_v42  ;;  %v2230_v24 = vperm.slane %v2226_v63, %v3903_v49 }
 0x43e   : > { %v2149_v56 = vsel %vm1008_vm2, 0, %v2148_v54  ;;  %v2243_v45 = vsel %vm1008_vm2, %v2148_v54, %v2141_v8 }
 0x43f   : > { %v2232_v10 = vsel %vm1008_vm2, %v2231_v29, %v2128_v2  ;;  %v2248_v13 = vrot.slane %v2149_v56, 4  ;;  %v2102_v52 = vpack.i.b16 %v2091_v41, %v2090_v51  ;;  %v2104_v6 = vshrl.u32 %v2091_v41, 16  ;;  %v2999_v2 = vld [vmem:[%s4504_s10] sm:$0xff] }
 0x440   : > { %v2236_v33 = vperm.slane %v2232_v10, %v3903_v49  ;;  %v2247_v53 = vperm.slane %v2243_v45, %v3903_v49  ;;  %2397 = vmatpush.bf16.msra.mxu0 %v2999_v2 }
 0x441   : > { %v2249_v11 = vsel %vm1008_vm2, %v2248_v13, %v2147_v5  ;;  %v2105_v20 = vpack.i.b16 %v2104_v6, %v2103_v37  ;;  %v2154_v61 = vperm.slane %v2102_v52, %v3903_v49 }
 0x442   : > { %v2237_v28 = vrot.slane %v2236_v33, 4  ;;  %v2253_v30 = vperm.slane %v2249_v11, %v3903_v49 }
 0x443   : > { %v2155_v44 = vrot.slane %v2154_v61, 4  ;;  %v2173_v46 = vperm.slane %v2105_v20, %v3903_v49  ;;  %v2160_v19 = vperm.slane %v2154_v61, %v3907_v1 }
 0x444   : > { %v2048_v27 = vpop.f32.mrf.mxu1  ;;  %v2238_v50 = vsel %vm1008_vm2, %v2237_v28, %v2230_v24  ;;  %v2254_v32 = vrot.slane %v2253_v30, 4 }
 0x445   : > { %v2156_v9 = vsel %vm1008_vm2, 0, %v2155_v44  ;;  %v2174_v48 = vrot.slane %v2173_v46, 4  ;;  %v2179_v21 = vperm.slane %v2173_v46, %v3907_v1  ;;  %v4328_v34 = vperm.slane %v2238_v50, %v3907_v1 }
 0x446   : > { %v2164_v35 = vperm.slane %v2156_v9, %v3907_v1  ;;  %v2255_v12 = vsel %vm1008_vm2, %v2254_v32, %v2247_v53  ;;  %v2165_v55 = vrot.slane %v2160_v19, 4 }
 0x447   : > { %v2175_v0 = vsel %vm1008_vm2, 0, %v2174_v48  ;;  %v4331_v25 = vperm.slane %v2255_v12, %v3907_v1  ;;  %v2184_v26 = vrot.slane %v2179_v21, 4  ;;  %v2331_v46 = vshrl.u32 %v4328_v34, 16 }
 0x448   : > { %v2167_v17 = vrot.slane %v2164_v35, 4  ;;  %v2183_v22 = vperm.slane %v2175_v0, %v3907_v1  ;;  %v2166_v40 = vsel %vm1008_vm2, 0, %v2165_v55 }
 0x449   : > { %v2330_v39 = vpack.i.b16 %v4331_v25, %v4328_v34  ;;  %v2185_v51 = vsel %vm1008_vm2, 0, %v2184_v26  ;;  %v2332_v33 = vshrl.u32 %v4331_v25, 16 }
 0x44a   : > { %v2084_v38 = vpop.f32.mrf.mxu3  ;;  %v2168_v57 = vsel %vm1008_vm2, 0, %v2167_v17  ;;  %v2186_v36 = vrot.slane %v2183_v22, 4  ;;  %v2260_v60 = vsel %vm1008_vm2, %v2167_v17, %v2160_v19 }
 0x44b   : > { %v2065_v58 = vpop.f32.mrf.mxu2  ;;  %v2093_v23 = vpack.c.bf16 %v2084_v38, %v2084_v38  ;;  %v2265_v31 = vrot.slane %v2168_v57, 4  ;;  %v2264_v56 = vperm.slane %v2260_v60, %v3903_v49  ;;  %v2333_v9 = vpack.i.b16 %v2332_v33, %v2331_v46 }
 0x44c   : > { %v2092_v62 = vpack.c.bf16 %v2065_v58, %v2065_v58  ;;  %v2187_v8 = vsel %vm1008_vm2, 0, %v2186_v36  ;;  %v2277_v54 = vsel %vm1008_vm2, %v2186_v36, %v2179_v21  ;;  %v2346_v34 = vunpack.c.l.b16 %v2330_v39 }
 0x44d   : > { %v2110_v16 = vshrl.u32 %v2093_v23, 16  ;;  %v2266_v7 = vsel %vm1008_vm2, %v2265_v31, %v2166_v40  ;;  %v2282_v43 = vrot.slane %v2187_v8, 4  ;;  %v2281_v13 = vperm.slane %v2277_v54, %v3903_v49 }
 0x44e   : > { %v2109_v3 = vshrl.u32 %v2092_v62, 16  ;;  %v2270_v47 = vperm.slane %v2266_v7, %v3903_v49  ;;  %v2108_v29 = vpack.i.b16 %v2093_v23, %v2092_v62  ;;  %v2351_v26 = vunpack.c.l.b16 %v2333_v9 }
 0x44f   : > { %v2283_v59 = vsel %vm1008_vm2, %v2282_v43, %v2185_v51 }
 0x450   : > { %v2111_v42 = vpack.i.b16 %v2110_v16, %v2109_v3  ;;  %v2271_v41 = vrot.slane %v2270_v47, 4  ;;  %v2287_v5 = vperm.slane %v2283_v59, %v3903_v49  ;;  %v2192_v10 = vperm.slane %v2108_v29, %v3903_v49 }
 0x452   : > { %v2211_v37 = vperm.slane %v2111_v42, %v3903_v49  ;;  %v2086_v63 = vpop.f32.mrf.mxu3  ;;  %v2193_v52 = vrot.slane %v2192_v10, 4  ;;  %v2198_v6 = vperm.slane %v2192_v10, %v3907_v1  ;;  %v2272_v11 = vsel %vm1008_vm2, %v2271_v41, %v2264_v56 }
 0x453   : > { %v2067_v45 = vpop.f32.mrf.mxu2  ;;  %v2288_v28 = vrot.slane %v2287_v5, 4  ;;  %v2276_v20 = vperm.slane %v2272_v11, %v3907_v1 }
 0x454   : > { %v2212_v30 = vrot.slane %v2211_v37, 4  ;;  %v2194_v61 = vsel %vm1008_vm2, 0, %v2193_v52  ;;  %v2217_v24 = vperm.slane %v2211_v37, %v3907_v1  ;;  %v2203_v50 = vrot.slane %v2198_v6, 4 }
 0x455   : > { %v2289_v44 = vsel %vm1008_vm2, %v2288_v28, %v2281_v13  ;;  %v2202_v53 = vperm.slane %v2194_v61, %v3907_v1  ;;  %v2337_v35 = vshrl.u32 %v2276_v20, 16 }
 0x456   : > { %v2213_v19 = vsel %vm1008_vm2, 0, %v2212_v30  ;;  %v2293_v27 = vperm.slane %v2289_v44, %v3907_v1  ;;  %v2222_v0 = vrot.slane %v2217_v24, 4  ;;  %v2204_v36 = vsel %vm1008_vm2, 0, %v2203_v50 }
 0x457   : > { %v2221_v32 = vperm.slane %v2213_v19, %v3907_v1  ;;  %v2205_v48 = vrot.slane %v2202_v53, 4 }
 0x458   : > { %v2338_v21 = vshrl.u32 %v2293_v27, 16  ;;  %v2336_v12 = vpack.i.b16 %v2293_v27, %v2276_v20  ;;  %v2223_v62 = vsel %vm1008_vm2, 0, %v2222_v0 }
 0x459   : > { %v2224_v25 = vrot.slane %v2221_v32, 4  ;;  %v2206_v55 = vsel %vm1008_vm2, 0, %v2205_v48  ;;  %v2294_v40 = vsel %vm1008_vm2, %v2205_v48, %v2198_v6  ;;  %v3573_v32 = vmov 32.0  }
 0x45a   : > { %v2339_v17 = vpack.i.b16 %v2338_v21, %v2337_v35  ;;  %v2347_v22 = vunpack.c.l.b16 %v2336_v12  ;;  %v2299_v57 = vrot.slane %v2206_v55, 4  ;;  %v2298_v3 = vperm.slane %v2294_v40, %v3903_v49 }
 0x45b   : > { %v2225_v38 = vsel %vm1008_vm2, 0, %v2224_v25  ;;  %v2311_v39 = vsel %vm1008_vm2, %v2224_v25, %v2217_v24  ;;  %3189 = vrcp.f32 %v3573_v32 }
 0x45c   : > { %v2316_v58 = vrot.slane %v2225_v38, 4  ;;  %v2352_v23 = vunpack.c.l.b16 %v2339_v17  ;;  %v2349_v31 = vpack.c.b16 %v2347_v22, %v2346_v34  ;;  %v2300_v8 = vsel %vm1008_vm2, %v2299_v57, %v2204_v36 }
 0x45d   : > { %v2304_v16 = vperm.slane %v2300_v8, %v3903_v49  ;;  %v2315_v51 = vperm.slane %v2311_v39, %v3903_v49  ;;  %v3001_v39 = vld [vmem:[#allocation16] sm:$0xff] }
 0x45e   : > { %v2317_v60 = vsel %vm1008_vm2, %v2316_v58, %v2223_v62  ;;  %v2354_v7 = vpack.c.b16 %v2352_v23, %v2351_v26 }
 0x45f   : > { %v2321_v43 = vperm.slane %v2317_v60, %v3903_v49  ;;  %v2305_v4 = vrot.slane %v2304_v16, 4  ;;  %v3002_v16 = vld [vmem:[#allocation16 + $0x8] sm:$0xff] }
 0x460   : > { %2356 = vrot.lane.b32.xlu2 %v2354_v7, %s3572_s28  ;;  %2532 = vmatpush.bf16.msra.mxu1 %v3002_v16 }
 0x461   : > { %v2322_v47 = vrot.slane %v2321_v43, 4  ;;  %v2306_v54 = vsel %vm1008_vm2, %v2305_v4, %v2298_v3 }
 0x462   : > { %v2310_v29 = vperm.slane %v2306_v54, %v3907_v1 }
 0x463   : > { %v2323_v59 = vsel %vm1008_vm2, %v2322_v47, %v2315_v51 }
 0x464   : > { %v2327_v42 = vperm.slane %v2323_v59, %v3907_v1  ;;  %v2343_v2 = vshrl.u32 %v2310_v29, 16  ;;  %v3158_v1 = vld [vmem:[%s4505_s11] ss:$0 sm:$0xff]  ;;  %2533 = vmatpush.bf16.msra.mxu1 %v3001_v39 }
 0x466   : > { %v2344_v56 = vshrl.u32 %v2327_v42, 16  ;;  %v2342_v41 = vpack.i.b16 %v2327_v42, %v2310_v29 }
 0x468   : > { %v2345_v5 = vpack.i.b16 %v2344_v56, %v2343_v2  ;;  %v2348_v49 = vunpack.c.l.b16 %v2342_v41 }
 0x46a   : > { %v2353_v10 = vunpack.c.l.b16 %v2345_v5  ;;  %v2350_v33 = vpack.c.b16 %v2348_v49, %v2348_v49  ;;  %v3160_v49 = vld [vmem:[%s4507_s13] ss:$0 sm:$0xff] }
 0x46c   : > { %v2355_v13 = vpack.c.b16 %v2353_v10, %v2353_v10  ;;  %v3159_v10 = vld [vmem:[%s4506_s12] ss:$0 sm:$0xff] }
 0x46e   : > { %2358 = vrot.lane.b32.xlu0 %v2355_v13, %s3572_s28  ;;  %s788_s28 = scalar_lea.vmem [#allocation17], %s3012_s8 }
 0x4ba   : > { %v2357_v37 = vpop.permute.xlu2 %2356 }
 0x4bb   : > { %v2362_v63 = vsel %vm824_vm0, %v2349_v31, %v2357_v37 }
 0x4bc   : > { %2958 = vmatmul.msk.bf16.vlgmr.msra.gmra.mxu0 %vm871_vm1, %v2362_v63 }
 0x4e0   : > { %v2359_v52 = vpop.permute.xlu0 %2358 }
 0x4e1   : > { %v2365_v6 = vsel %vm824_vm0, %v2350_v33, %v2359_v52 }
 0x4e2   : > { %2959 = vmatmul.msk.bf16.gmra.mxu0 %vm871_vm1, %v2365_v6 }
 0x539   : > { %v2399_v45 = vpop.f32.mrf.mxu0 }
 0x53a   : > { %v2400_v11 = vadd.f32 %v3158_v1, %v2399_v45 }
 0x53c   : > { %v2408_v28 = vadd.f32 %v2400_v11, %v3863_v14  ;;  %v3190_v14 = vpop.eup %3189 }
 0x53d   : > { %v2423_v9 = vmul.f32 32.0, %v3190_v14  ;;  %vm2427_vm5 = vweird.f32 %v3190_v14 }
 0x53e   : > { %v2413_v30 = vsel %vm871_vm1, %v2408_v28, 0.0 }
 0x53f   : > { %2414 = vadd.xlane.f32.xlu2 %v2413_v30  ;;  %v2424_v48 = vsub.f32 1.0, %v2423_v9 }
 0x541   : > { %v2401_v20 = vpop.f32.mrf.mxu0  ;;  %v2425_v35 = vmul.f32 %v3190_v14, %v2424_v48  ;;  %v3006_v48 = vld [vmem:[%s4553_s7 + $0x18] sm:$0xff] }
 0x542   : > { %v2402_v61 = vadd.f32 %v3158_v1, %v2401_v20  ;;  %2596 = vmatpush.bf16.msra.mxu2 %v3006_v48 }
 0x543   : > { %v2426_v21 = vadd.f32 %v3190_v14, %v2425_v35  ;;  %v3005_v35 = vld [vmem:[%s4553_s7 + $0x10] sm:$0xff] }
 0x544   : > { %v2409_v24 = vadd.f32 %v2402_v61, %v3865_v15 }
 0x545   : > { %v4397_v15 = vsel %vm2427_vm5, %v3190_v14, %v2426_v21  ;;  %v3004_v21 = vld [vmem:[%s4553_s7 + $0x8] sm:$0xff]  ;;  %vm2696_vm5 = vcmask 257024  }
 0x546   : > { %v2416_v44 = vsel %vm871_vm1, %v2409_v24, 0.0  ;;  %2597 = vmatpush.bf16.msra.mxu2 %v3005_v35  ;;  %v3164_v35 = vld [vmem:[%s4557_s6] ss:$0 sm:$0xff]  ;;  %s3493_s6 = scalar_lea.hbm %s4558_s30, 24 }
 0x547   : > { %2417 = vadd.xlane.f32.xlu0 %v2416_v44 }
 0x54a   : > { %2598 = vmatpush.bf16.msra.mxu2 %v3004_v21 }
 0x55f   : > { %v2404_v46 = vpop.f32.mrf.mxu0 }
 0x560   : > { %v2405_v53 = vadd.f32 %v3158_v1, %v2404_v46 }
 0x562   : > { %v2410_v19 = vadd.f32 %v2405_v53, %v3871_v18 }
 0x564   : > { %v2419_v27 = vsel %vm871_vm1, %v2410_v19, 0.0 }
 0x565   : > { %2420 = vadd.xlane.f32.xlu1 %v2419_v27 }
 0x567   : > { %v2406_v50 = vpop.f32.mrf.mxu0 }
 0x5b2   : > { %v2415_v12 = vpop.xlane.xlu2 %2414 }
 0x5b3   : > { %v2429_v0 = vmul.f32 %v4397_v15, %v2415_v12  ;;  %v3003_v12 = vld [vmem:[%s4553_s7] sm:$0xff] }
 0x5b4   : > { %2599 = vmatpush.bf16.msra.mxu2 %v3003_v12 }
 0x5b5   : > { %v2432_v25 = vsub.f32 %v2408_v28, %v2429_v0 }
 0x5b7   : > { %v2435_v55 = vmul.f32 %v2432_v25, %v2432_v25 }
 0x5b9   : > { %v2438_v18 = vsel %vm871_vm1, %v2435_v55, 0.0 }
 0x5ba   : > { %v2418_v17 = vpop.xlane.xlu0 %2417  ;;  %2439 = vadd.xlane.f32.xlu1 %v2438_v18 }
 0x5bb   : > { %v2430_v34 = vmul.f32 %v4397_v15, %v2418_v17 }
 0x5bd   : > { %v2433_v22 = vsub.f32 %v2409_v24, %v2430_v34 }
 0x5bf   : > { %v2436_v38 = vmul.f32 %v2433_v22, %v2433_v22 }
 0x5c1   : > { %v2441_v57 = vsel %vm871_vm1, %v2436_v38, 0.0 }
 0x5c2   : > { %2442 = vadd.xlane.f32.xlu1 %v2441_v57 }
 0x5d8   : > { %v2421_v26 = vpop.xlane.xlu1 %2420 }
 0x5d9   : > { %v2431_v36 = vmul.f32 %v4397_v15, %v2421_v26 }
 0x5db   : > { %v2434_v58 = vsub.f32 %v2410_v19, %v2431_v36 }
 0x5dd   : > { %v2437_v23 = vmul.f32 %v2434_v58, %v2434_v58 }
 0x5df   : > { %v2444_v31 = vsel %vm871_vm1, %v2437_v23, 0.0 }
 0x5e0   : > { %2445 = vadd.xlane.f32.xlu1 %v2444_v31  ;;  %v3162_v31 = vld [vmem:[%s4555_s4] ss:$0 sm:$0xff]  ;;  %s2713_s4 = sshll.u32 %s788_s28, 4  ;;  %s2714_s4 = int_to_ptr.vmem [resolvable:$true] %s2713_s4 }
 0x62d   : > { %v2440_v62 = vpop.xlane.xlu1 %2439 }
 0x62e   : > { %v2447_v40 = vmul.f32 %v2440_v62, %v4397_v15 }
 0x630   : > { %v2450_v8 = vadd.f32 1e-05, %v2447_v40 }
 0x632   : > { %3191 = vrsqrt.f32 %v2450_v8  ;;  %vm2459_vm7 = vweird.f32 %v2450_v8 }
 0x635   : > { %v2443_v60 = vpop.xlane.xlu1 %2442 }
 0x636   : > { %v2448_v7 = vmul.f32 %v2443_v60, %v4397_v15 }
 0x638   : > { %v3192_v43 = vpop.eup %3191  ;;  %v2451_v3 = vadd.f32 1e-05, %v2448_v7 }
 0x639   : > { %v2454_v4 = vmul.f32 %v3192_v43, %v2450_v8  ;;  %vm2460_vm6 = vweird.f32 %v3192_v43 }
 0x63a   : > { %3193 = vrsqrt.f32 %v2451_v3  ;;  %vm2461_vm8 = vmor %vm2459_vm7, %vm2460_vm6  ;;  %vm2469_vm10 = vweird.f32 %v2451_v3 }
 0x63b   : > { %v2455_v51 = vmul.f32 %v3192_v43, %v2454_v4 }
 0x63d   : > { %v2456_v47 = vmul.f32 0.5, %v2455_v51 }
 0x63f   : > { %v2457_v54 = vsub.f32 1.5, %v2456_v47 }
 0x640   : > { %v3194_v29 = vpop.eup %3193 }
 0x641   : > { %v2458_v59 = vmul.f32 %v3192_v43, %v2457_v54  ;;  %v2464_v42 = vmul.f32 %v3194_v29, %v2451_v3  ;;  %vm2470_vm9 = vweird.f32 %v3194_v29 }
 0x642   : > { %vm2471_vm11 = vmor %vm2469_vm10, %vm2470_vm9 }
 0x643   : > { %v2465_v2 = vmul.f32 %v3194_v29, %v2464_v42  ;;  %v2462_v56 = vsel %vm2461_vm8, %v3192_v43, %v2458_v59 }
 0x644   : > { %v2483_v13 = vmul.f32 %v2462_v56, %v2432_v25  ;;  %v3161_v25 = vld [vmem:[%s4554_s21] ss:$0 sm:$0xff] }
 0x645   : > { %v2466_v41 = vmul.f32 0.5, %v2465_v2 }
 0x646   : > { %v2489_v33 = vmul.f32 %v3159_v10, %v2483_v13 }
 0x647   : > { %v2467_v5 = vsub.f32 1.5, %v2466_v41 }
 0x648   : > { %v2495_v1 = vadd.f32 %v3160_v49, %v2489_v33 }
 0x649   : > { %v2468_v37 = vmul.f32 %v3194_v29, %v2467_v5 }
 0x64b   : > { %v2472_v63 = vsel %vm2471_vm11, %v3194_v29, %v2468_v37 }
 0x64c   : > { %v2484_v52 = vmul.f32 %v2472_v63, %v2433_v22 }
 0x64e   : > { %v2490_v6 = vmul.f32 %v3159_v10, %v2484_v52 }
 0x650   : > { %v2496_v45 = vadd.f32 %v3160_v49, %v2490_v6 }
 0x652   : > { %v2498_v11 = vpack.c.bf16 %v2496_v45, %v2495_v1 }
 0x653   : > { %v2446_v28 = vpop.xlane.xlu1 %2445 }
 0x654   : > { %v2449_v30 = vmul.f32 %v2446_v28, %v4397_v15  ;;  %2968 = vmatmul.msk.bf16.vlgmr.msra.gmra.mxu1 %vm871_vm1, %v2498_v11 }
 0x656   : > { %v2452_v20 = vadd.f32 1e-05, %v2449_v30 }
 0x658   : > { %3195 = vrsqrt.f32 %v2452_v20  ;;  %vm2479_vm13 = vweird.f32 %v2452_v20 }
 0x65e   : > { %v3196_v61 = vpop.eup %3195 }
 0x65f   : > { %v2474_v24 = vmul.f32 %v3196_v61, %v2452_v20  ;;  %vm2480_vm12 = vweird.f32 %v3196_v61 }
 0x660   : > { %vm2481_vm14 = vmor %vm2479_vm13, %vm2480_vm12 }
 0x661   : > { %v2475_v44 = vmul.f32 %v3196_v61, %v2474_v24 }
 0x663   : > { %v2476_v46 = vmul.f32 0.5, %v2475_v44 }
 0x665   : > { %v2477_v53 = vsub.f32 1.5, %v2476_v46 }
 0x667   : > { %v2478_v19 = vmul.f32 %v3196_v61, %v2477_v53 }
 0x669   : > { %v2482_v27 = vsel %vm2481_vm14, %v3196_v61, %v2478_v19 }
 0x66a   : > { %v2485_v50 = vmul.f32 %v2482_v27, %v2434_v58 }
 0x66c   : > { %v2491_v32 = vmul.f32 %v3159_v10, %v2485_v50 }
 0x66e   : > { %v2497_v14 = vadd.f32 %v3160_v49, %v2491_v32  ;;  %v3163_v32 = vld [vmem:[%s4556_s17] ss:$0 sm:$0xff]  ;;  %s3489_s17 = scalar_lea.hbm %s3488_s29, 12 }
 0x66f   : > { %p3490_p1 = scmp.ne.s32.totalorder %s3488_s29, %s3489_s17  ;;  %p3495_p8 = scmp.lt.s32.totalorder %s3493_s6, %s3489_s17 }
 0x670   : > { %v2499_v9 = vpack.c.bf16 %v2497_v14, %v2497_v14 }
 0x671   : > { %p3491_p5 = pnand %p3490_p1, %p3796_p4  ;;  %p3496_p9 = por %p3495_p8, %p3494_p7 }
 0x672   : > { %2969 = vmatmul.msk.bf16.gmra.mxu1 %vm871_vm1, %v2499_v9 }
 0x673   : > { %p3492_p12 = pneg %p3491_p5 }
 0x675   : > { %p3497_p10 = pnand %p3496_p9, %p3492_p12 }
 0x6d1   : > { %v2535_v0 = vpop.f32.mrf.mxu1 }
 0x6d2   : > { %v2536_v55 = vadd.f32 %v3161_v25, %v2535_v0 }
 0x6d4   : > { %v2544_v34 = vmax.f32 %v2536_v55, 0.0 }
 0x6d9   : > { %v2537_v18 = vpop.f32.mrf.mxu1 }
 0x6da   : > { %v2538_v17 = vadd.f32 %v3161_v25, %v2537_v18 }
 0x6dc   : > { %v2545_v22 = vmax.f32 %v2538_v17, 0.0 }
 0x6de   : > { %v2547_v38 = vpack.c.bf16 %v2545_v22, %v2544_v34 }
 0x6e0   : > { %2986 = vmatmul.msk.bf16.vlgmr.msra.gmra.mxu2 %vm2585_vm15, %v2547_v38 }
 0x6ef   : > { %v2540_v57 = vpop.f32.mrf.mxu1 }
 0x6f0   : > { %v2541_v26 = vadd.f32 %v3161_v25, %v2540_v57 }
 0x6f2   : > { %v2546_v36 = vmax.f32 %v2541_v26, 0.0 }
 0x6f4   : > { %v2548_v58 = vpack.c.bf16 %v2546_v36, %v2546_v36 }
 0x6f6   : > { %2987 = vmatmul.msk.bf16.gmra.mxu2 %vm2585_vm15, %v2548_v58 }
 0x6f7   : > { %v2542_v23 = vpop.f32.mrf.mxu1 }
 0x763   : > { %v2601_v62 = vpop.f32.mrf.mxu2 }
 0x764   : > { %v2602_v40 = vadd.f32 %v3162_v31, %v2601_v62 }
 0x766   : > { %v2610_v8 = vadd.f32 %v2602_v40, %v2495_v1 }
 0x768   : > { %v2615_v16 = vsel %vm871_vm1, %v2610_v8, 0.0 }
 0x769   : > { %2616 = vadd.xlane.f32.xlu2 %v2615_v16 }
 0x76b   : > { %v2603_v39 = vpop.f32.mrf.mxu2 }
 0x76c   : > { %v2604_v60 = vadd.f32 %v3162_v31, %v2603_v39 }
 0x76e   : > { %v2611_v7 = vadd.f32 %v2604_v60, %v2496_v45 }
 0x770   : > { %v2618_v43 = vsel %vm871_vm1, %v2611_v7, 0.0 }
 0x771   : > { %2619 = vadd.xlane.f32.xlu1 %v2618_v43 }
 0x779   : > { %v2606_v3 = vpop.f32.mrf.mxu2 }
 0x77a   : > { %v2607_v4 = vadd.f32 %v3162_v31, %v2606_v3 }
 0x77c   : > { %v2612_v51 = vadd.f32 %v2607_v4, %v2497_v14 }
 0x77e   : > { %v2621_v47 = vsel %vm871_vm1, %v2612_v51, 0.0 }
 0x77f   : > { %2622 = vadd.xlane.f32.xlu2 %v2621_v47 }
 0x781   : > { %v2608_v54 = vpop.f32.mrf.mxu2 }
 0x7dc   : > { %v2617_v29 = vpop.xlane.xlu2 %2616 }
 0x7dd   : > { %v2624_v59 = vmul.f32 %v2617_v29, %v4397_v15 }
 0x7df   : > { %v2627_v42 = vsub.f32 %v2610_v8, %v2624_v59 }
 0x7e1   : > { %v2630_v2 = vmul.f32 %v2627_v42, %v2627_v42 }
 0x7e3   : > { %v2633_v56 = vsel %vm871_vm1, %v2630_v2, 0.0 }
 0x7e4   : > { %2634 = vadd.xlane.f32.xlu1 %v2633_v56  ;;  %v2620_v41 = vpop.xlane.xlu1 %2619 }
 0x7e5   : > { %v2625_v5 = vmul.f32 %v2620_v41, %v4397_v15 }
 0x7e7   : > { %v2628_v10 = vsub.f32 %v2611_v7, %v2625_v5 }
 0x7e9   : > { %v2631_v13 = vmul.f32 %v2628_v10, %v2628_v10 }
 0x7eb   : > { %v2636_v37 = vsel %vm871_vm1, %v2631_v13, 0.0 }
 0x7ec   : > { %2637 = vadd.xlane.f32.xlu0 %v2636_v37 }
 0x7f2   : > { %v2623_v63 = vpop.xlane.xlu2 %2622 }
 0x7f3   : > { %v2626_v49 = vmul.f32 %v2623_v63, %v4397_v15 }
 0x7f5   : > { %v4442_v33 = vsub.f32 %v2612_v51, %v2626_v49 }
 0x7f7   : > { %v2632_v52 = vmul.f32 %v4442_v33, %v4442_v33 }
 0x7f9   : > { %v2639_v6 = vsel %vm871_vm1, %v2632_v52, 0.0 }
 0x7fa   : > { %2640 = vadd.xlane.f32.xlu2 %v2639_v6 }
 0x857   : > { %v2635_v1 = vpop.xlane.xlu1 %2634 }
 0x858   : > { %v2642_v45 = vmul.f32 %v2635_v1, %v4397_v15 }
 0x85a   : > { %v2645_v11 = vadd.f32 1e-05, %v2642_v45 }
 0x85c   : > { %3197 = vrsqrt.f32 %v2645_v11  ;;  %vm2654_vm1 = vweird.f32 %v2645_v11 }
 0x85f   : > { %v2638_v28 = vpop.xlane.xlu0 %2637 }
 0x860   : > { %v2643_v30 = vmul.f32 %v2638_v28, %v4397_v15 }
 0x862   : > { %v3198_v20 = vpop.eup %3197  ;;  %v2646_v61 = vadd.f32 1e-05, %v2643_v30 }
 0x863   : > { %v2649_v24 = vmul.f32 %v3198_v20, %v2645_v11  ;;  %vm2655_vm0 = vweird.f32 %v3198_v20 }
 0x864   : > { %3199 = vrsqrt.f32 %v2646_v61  ;;  %vm2656_vm2 = vmor %vm2654_vm1, %vm2655_vm0  ;;  %vm2664_vm4 = vweird.f32 %v2646_v61 }
 0x865   : > { %v2650_v44 = vmul.f32 %v3198_v20, %v2649_v24 }
 0x867   : > { %v2651_v46 = vmul.f32 0.5, %v2650_v44 }
 0x869   : > { %v2652_v53 = vsub.f32 1.5, %v2651_v46 }
 0x86a   : > { %v3200_v19 = vpop.eup %3199 }
 0x86b   : > { %v2653_v27 = vmul.f32 %v3198_v20, %v2652_v53  ;;  %v2659_v50 = vmul.f32 %v3200_v19, %v2646_v61  ;;  %vm2665_vm3 = vweird.f32 %v3200_v19 }
 0x86c   : > { %vm2666_vm6 = vmor %vm2664_vm4, %vm2665_vm3 }
 0x86d   : > { %v2657_v14 = vsel %vm2656_vm2, %v3198_v20, %v2653_v27  ;;  %v2660_v9 = vmul.f32 %v3200_v19, %v2659_v50  ;;  %v2641_v48 = vpop.xlane.xlu2 %2640 }
 0x86e   : > { %v2678_v21 = vmul.f32 %v2657_v14, %v2627_v42  ;;  %v2644_v12 = vmul.f32 %v2641_v48, %v4397_v15 }
 0x86f   : > { %v2661_v0 = vmul.f32 0.5, %v2660_v9 }
 0x870   : > { %v2684_v25 = vmul.f32 %v3163_v32, %v2678_v21  ;;  %v2647_v55 = vadd.f32 1e-05, %v2644_v12 }
 0x871   : > { %v2662_v18 = vsub.f32 1.5, %v2661_v0 }
 0x872   : > { %v2690_v17 = vadd.f32 %v3164_v35, %v2684_v25  ;;  %3201 = vrsqrt.f32 %v2647_v55  ;;  %vm2674_vm8 = vweird.f32 %v2647_v55 }
 0x873   : > { %v2663_v34 = vmul.f32 %v3200_v19, %v2662_v18 }
 0x874   : > { %v2693_v22 = vpack.c.bf16 %v2690_v17, %v2690_v17 }
 0x875   : > { %v2667_v38 = vsel %vm2666_vm6, %v3200_v19, %v2663_v34 }
 0x876   : > { %v2679_v57 = vmul.f32 %v2667_v38, %v2628_v10  ;;  %2697 = vst.msk [vmem:[%s788_s28] sm:$0xf] %vm2696_vm5, %v2693_v22 }
 0x878   : > { %v3202_v15 = vpop.eup %3201  ;;  %v2685_v26 = vmul.f32 %v3163_v32, %v2679_v57 }
 0x879   : > { %v2669_v36 = vmul.f32 %v3202_v15, %v2647_v55  ;;  %vm2675_vm7 = vweird.f32 %v3202_v15 }
 0x87a   : > { %v2691_v58 = vadd.f32 %v3164_v35, %v2685_v26  ;;  %vm2676_vm9 = vmor %vm2674_vm8, %vm2675_vm7 }
 0x87b   : > { %v2670_v23 = vmul.f32 %v3202_v15, %v2669_v36 }
 0x87c   : > { %v2694_v31 = vpack.c.bf16 %v2691_v58, %v2691_v58 }
 0x87d   : > { %v2671_v62 = vmul.f32 0.5, %v2670_v23 }
 0x87e   : > { %2698 = vst.msk [vmem:[%s788_s28 + $0x4] sm:$0xf] %vm2696_vm5, %v2694_v31 }
 0x87f   : > { %v2672_v40 = vsub.f32 1.5, %v2671_v62 }
 0x881   : > { %v2673_v8 = vmul.f32 %v3202_v15, %v2672_v40 }
 0x883   : > { %v2677_v16 = vsel %vm2676_vm9, %v3202_v15, %v2673_v8 }
 0x884   : > { %v2680_v39 = vmul.f32 %v2677_v16, %v4442_v33 }
 0x886   : > { %v2686_v60 = vmul.f32 %v3163_v32, %v2680_v39 }
 0x888   : > { %v2692_v7 = vadd.f32 %v3164_v35, %v2686_v60 }
 0x88a   : > { %v2695_v43 = vpack.c.bf16 %v2692_v7, %v2692_v7 }
 0x88c   : > { %2699 = vst.msk [vmem:[%s788_s28 + $0x8] sm:$0xf] %vm2696_vm5, %v2695_v43 }
 0x88d   : > { %3500 = shalt.err (!%p3497_p10)
}
 0x88e   : > { %s3574_s9 = smov 64   ;;  %s3575_s28 = smov 4  }
 0x88f   : > { %3047 = dma.vmem_to_hbm [thread:$0]  (%p3796_p4), %s2714_s4, 192, %s2716_s15, %s2701_s27, %s3574_s9, %s3574_s9, %s3575_s28  }
 0x890 PF: > { %s2730_s20 = sand.u32 1, %s3543_s1   ;;  %p4559_p11 = scmp.ge.s32.totalorder %s3555_s24, 2 }
 0x891   : > { %s2731_s21 = scalar_lea.sflag [#allocation4], %s2730_s20 }
 0x892   : > { %p3079_p13 = pnand %p4559_p11, %p3800_p6 }
 0x894   : > { %p3080_p0 = pneg %p3079_p13 }
 0x896   : > { %3538 = dma.done.wait (%p3080_p0), %s2731_s21, 192  }
 0x897   : > { %3540 = vsyncadd (%p3080_p0), %s2731_s21, 4294967104  ;;  %p37_p2 = scmp.ge.s32.totalorder %s3774_s25, 4   ;;  %s4560_s1 = smov %s3547_s22 }
 0x898   : > { %s4561_s22 = smov %s3551_s23  ;;  %s4562_s23 = smov %s3785_s16 }
 0x899   : > { %s4563_s24 = smov %s3774_s25  ;;  %39 = sbr.rel (!%p37_p2) target bundleno = 27 (0x1b), region = 180 }
 0x89e   :  { %2737 = vsyncpa [#allocation3], 1 }
 0x89f   :  { %2739 = vsyncpa [#allocation3 + $0x1], 1 }
 0x8a0   :  { %2740 = vsyncpa [#allocation6], 1 }
 0x8a1   :  { %2741 = vsyncpa [#allocation9], 1 }
 0x8a2   :  { %2742 = vsyncpa [#allocation12], 1 }
 0x8a3   :  { %2743 = vsyncpa [#allocation15], 1 }
 0x8a4   :  { %2744 = vsyncpa [#allocation4], 1 }
 0x8a5   :  { %2746 = vsyncpa [#allocation4 + $0x1], 1 }

</bundles_post_ra>
